<compile_context>
chip_gen: v5e
topology: v5e:2x2
jax: 0.10.0
libtpu: 0.0.40
codegen_flags: <defaults>
</compile_context>

<pallas_src>
from functools import partial

import numpy as np
import jax
import jax.numpy as jnp
from jax import lax
from jax.experimental import pallas as pl
from jax.experimental.pallas import tpu as pltpu

N_WIRES = 4
N_BLOCKS = 8
DIM = 16          # 2**N_WIRES
IMG = 28          # MNIST-like spatial size implied by avg_pool2d(x, 6).view(bsz, 16)
FLAT = IMG * IMG

# Default batch tile.  Must be a multiple of 128 (lane-dense output blocks).
# TB=2048 -> x double-buffer ~12.5 MiB + ~4 MiB intermediates, fits the 32 MiB
# scoped-VMEM limit on v5e/v6e/v7x while amortizing the ~0.35 us/step overhead
# under the ~4.5 us per-tile HBM read.
BLOCK_B_DEFAULT = 2048


# ----------------------------------------------------------------------------
# Glue: constant matrices and parameter setup (numpy, float64/complex128)
# ----------------------------------------------------------------------------
def _ry(t):
    c, s = np.cos(t / 2), np.sin(t / 2)
    return np.array([[c, -s], [s, c]], dtype=np.complex128)


def _rz(t):
    return np.array([[np.exp(-1j * t / 2), 0], [0, np.exp(1j * t / 2)]],
                    dtype=np.complex128)


def _rx(t):
    c, s = np.cos(t / 2), np.sin(t / 2)
    return np.array([[c, -1j * s], [-1j * s, c]], dtype=np.complex128)


def _u3(theta, phi, lam):
    ct, st = np.cos(theta / 2), np.sin(theta / 2)
    return np.array(
        [[ct, -np.exp(1j * lam) * st],
         [np.exp(1j * phi) * st, np.exp(1j * (phi + lam)) * ct]],
        dtype=np.complex128)


def _kron_all(mats):
    out = mats[0]
    for m in mats[1:]:
        out = np.kron(out, m)
    return out


def _embed1(g, w):
    mats = [np.eye(2, dtype=np.complex128) for _ in range(N_WIRES)]
    mats[w] = g
    return _kron_all(mats)


def _embed_cu3(u, c, t):
    I2 = np.eye(2, dtype=np.complex128)
    P0 = np.array([[1, 0], [0, 0]], dtype=np.complex128)
    P1 = np.array([[0, 0], [0, 1]], dtype=np.complex128)
    a = [I2] * N_WIRES
    b = [I2] * N_WIRES
    a[c] = P0
    b[c] = P1
    b[t] = u
    return _kron_all(a) + _kron_all(b)


def build_ansatz_unitary(params):
    """U3CU3Layer0: per block, U3 on every wire then CU3 on ring (0,1),(1,2),(2,3),(3,0)."""
    U = np.eye(DIM, dtype=np.complex128)
    for blk in range(N_BLOCKS):
        for w in range(N_WIRES):
            U = _embed1(_u3(*params[blk, 0, w]), w) @ U
        for k in range(N_WIRES):
            c, t = k, (k + 1) % N_WIRES
            U = _embed_cu3(_u3(*params[blk, 1, k]), c, t) @ U
    return U


def build_pool_matrix():
    """(784, 16): avg_pool2d(kernel=6, stride=6) on 28x28, then row-major flatten."""
    W = np.zeros((FLAT, DIM), dtype=np.float32)
    for i in range(4):
        for j in range(4):
            for u in range(6):
                for v in range(6):
                    W[(6 * i + u) * IMG + (6 * j + v), i * 4 + j] = 1.0 / 36.0
    return W


def build_z_obs():
    """(16, 4): Z[idx, w] = +1 if bit of wire w in basis state idx is 0 else -1."""
    Z = np.zeros((DIM, N_WIRES), dtype=np.float32)
    for idx in range(DIM):
        for w in range(N_WIRES):
            Z[idx, w] = 1.0 - 2.0 * ((idx >> (N_WIRES - 1 - w)) & 1)
    return Z


def build_bit_table():
    """(16, 4): bits[idx, w] = bit of wire w in basis state idx (wire 0 = MSB)."""
    T = np.zeros((DIM, N_WIRES), dtype=np.float32)
    for idx in range(DIM):
        for w in range(N_WIRES):
            T[idx, w] = float((idx >> (N_WIRES - 1 - w)) & 1)
    return T


def build_constants(params_np):
    """Pre-compose everything data-independent into small f32 matrices."""
    U = build_ansatz_unitary(params_np)                   # (16, 16) complex128
    Ur, Ui = np.real(U), np.imag(U)
    # [o_re; o_im] = WRE @ psi_re + WIM @ psi_im   (fused complex matmul)
    wre = np.vstack([Ur, Ui]).astype(np.float32)          # (32, 16)
    wim = np.vstack([-Ui, Ur]).astype(np.float32)         # (32, 16)
    Z = build_z_obs()
    zt2 = np.hstack([Z.T, Z.T]).astype(np.float32)        # (4, 32): Z^T on |re|^2+|im|^2
    wpool = build_pool_matrix()                           # (784, 16)
    eye16 = np.eye(DIM, dtype=np.float32)                 # (16, 16) for the NT layout pivot
    bits = build_bit_table()                              # (16, 4)
    return (jnp.asarray(wpool), jnp.asarray(eye16), jnp.asarray(wre),
            jnp.asarray(wim), jnp.asarray(zt2), jnp.asarray(bits))


# ----------------------------------------------------------------------------
# Pallas kernel (one batch tile of TB samples per grid step)
# ----------------------------------------------------------------------------
def quantum_classifier_kernel(x_ref, wpool_ref, eye_ref, wre_ref, wim_ref,
                              zt2_ref, bits_ref, out_ref):
    # x_ref: (TB, 784) | wpool: (784, 16) | eye: (16, 16) | wre/wim: (32, 16)
    # zt2: (4, 32)     | bits: (16, 4)    | out: (4, TB)

    # avg_pool2d(x, 6).view(bsz, 16) as one MXU matmul.  Orientation is chosen
    # so the small (784, 16) pool matrix is the MXU weight operand and the big
    # x tile streams through in its natural layout.
    feats = jnp.dot(x_ref[...], wpool_ref[...],
                    preferred_element_type=jnp.float32)                 # (TB, 16)

    # Layout pivot to batch-on-lanes: featsT = I @ feats^T via an NT dot_general
    # (same "contract both operands on their last dim" pattern as q @ k^T).
    # Only the tiny (TB, 16) intermediate gets transposed, not the raw x tile.
    featsT = lax.dot_general(eye_ref[...], feats,
                             dimension_numbers=(((1,), (1,)), ((), ())),
                             preferred_element_type=jnp.float32)        # (16, TB)

    # Encoder '4x4_ryzxy': hoisted transcendentals (2 EUP calls on the whole
    # tile), then the single-qubit Ry(a)->Rz(b)->Rx(c)->Ry(d) algebra for all 4
    # wires at once on (4, TB) slabs.  Row w of each slab = wire w.
    ch = jnp.cos(0.5 * featsT)
    sh = jnp.sin(0.5 * featsT)
    ca, cb, cc, cd = ch[0:4], ch[4:8], ch[8:12], ch[12:16]
    sa, sb, sc, sd = sh[0:4], sh[4:8], sh[8:12], sh[12:16]

    # Ry(a)|0> = (cos a/2, sin a/2)  (real);  then Rz(b):
    t0r = ca * cb
    t0i = -(ca * sb)
    t1r = sa * cb
    t1i = sa * sb
    # Rx(c):
    w0r = cc * t0r + sc * t1i
    w0i = cc * t0i - sc * t1r
    w1r = sc * t0i + cc * t1r
    w1i = cc * t1i - sc * t0r
    # Ry(d):
    u0r = cd * w0r - sd * w1r
    u0i = cd * w0i - sd * w1i
    u1r = sd * w0r + cd * w1r
    u1i = sd * w0i + cd * w1i

    # Tensor the per-wire 2-vectors into the 16-dim product state (DIM, TB),
    # selecting component 0/1 per basis state with the precomputed bit table.
    bits = bits_ref[...]                                                # (16, 4)
    psi_re = None
    psi_im = None
    for w in range(N_WIRES):
        bit = bits[:, w:w + 1]                                          # (16, 1)
        f_re = u0r[w:w + 1] + bit * (u1r[w:w + 1] - u0r[w:w + 1])       # (16, TB)
        f_im = u0i[w:w + 1] + bit * (u1i[w:w + 1] - u0i[w:w + 1])
        if psi_re is None:
            psi_re, psi_im = f_re, f_im
        else:
            psi_re, psi_im = (psi_re * f_re - psi_im * f_im,
                              psi_re * f_im + psi_im * f_re)

    # Trainable ansatz (pre-composed 16x16 unitary): fused complex matmul,
    # [o_re; o_im] stacked along sublanes -> (32, TB).
    o = (jnp.dot(wre_ref[...], psi_re, preferred_element_type=jnp.float32)
         + jnp.dot(wim_ref[...], psi_im, preferred_element_type=jnp.float32))

    # MeasureAll(PauliZ): <Z_w> = Z^T @ (|re|^2 + |im|^2), fused over the stack.
    out_ref[...] = jnp.dot(zt2_ref[...], o * o,
                           preferred_element_type=jnp.float32)          # (4, TB)


# ----------------------------------------------------------------------------
# Wrapper: batch tiling / padding, lane-dense (4, B) output transposed back
# ----------------------------------------------------------------------------
def _round_up(a, m):
    return ((a + m - 1) // m) * m


@partial(jax.jit, static_argnames=("block_b",))
def quantum_classifier_forward(x, wpool, eye16, wre, wim, zt2, bits,
                               *, block_b=BLOCK_B_DEFAULT):
    assert block_b % 128 == 0, "block_b must be a multiple of 128 (lane-dense tiles)"
    bsz = x.shape[0]
    x_flat = x.reshape(bsz, FLAT)   # NCHW (C=1) flattened row-major, same as .view()

    # Pick the batch tile: full (padded-to-8) batch if small, else block_b.
    # (When bsz is already a multiple of the tile, jnp.pad is a no-op and no
    #  extra HBM copy is made; otherwise a single pad copy is accepted.)
    tb = min(block_b, _round_up(bsz, 8))
    b_pad = _round_up(bsz, tb)
    if b_pad != bsz:
        x_flat = jnp.pad(x_flat, ((0, b_pad - bsz), (0, 0)))
    num_tiles = b_pad // tb

    out_t = pl.pallas_call(
        quantum_classifier_kernel,
        out_shape=jax.ShapeDtypeStruct((N_WIRES, b_pad), jnp.float32),
        grid=(num_tiles,),
        in_specs=[
            pl.BlockSpec((tb, FLAT), lambda i: (i, 0)),         # x: batch-tiled, pipelined
            pl.BlockSpec((FLAT, DIM), lambda i: (0, 0)),        # pooling matrix (resident)
            pl.BlockSpec((DIM, DIM), lambda i: (0, 0)),         # identity (resident)
            pl.BlockSpec((2 * DIM, DIM), lambda i: (0, 0)),     # WRE (resident)
            pl.BlockSpec((2 * DIM, DIM), lambda i: (0, 0)),     # WIM (resident)
            pl.BlockSpec((N_WIRES, 2 * DIM), lambda i: (0, 0)), # [Z^T | Z^T] (resident)
            pl.BlockSpec((DIM, N_WIRES), lambda i: (0, 0)),     # bit table (resident)
        ],
        out_specs=pl.BlockSpec((N_WIRES, tb), lambda i: (0, i)),
        compiler_params=pltpu.CompilerParams(
            dimension_semantics=("parallel",),
            vmem_limit_bytes=32 * 1024 * 1024),
    )(x_flat, wpool, eye16, wre, wim, zt2, bits)

    return out_t[:, :bsz].T          # (bsz, 4), wire order 0..3


# ----------------------------------------------------------------------------
# Independent numpy reference (gate-by-gate full state-vector simulation)
# ----------------------------------------------------------------------------
def reference_forward(x_np, params_np):
    bsz = x_np.shape[0]
    W = build_pool_matrix().astype(np.float64)
    feats = x_np.reshape(bsz, FLAT) @ W
    U_ans = build_ansatz_unitary(params_np)
    Z = build_z_obs().astype(np.float64)
    out = np.zeros((bsz, N_WIRES))
    for bidx in range(bsz):
        psi = np.zeros(DIM, dtype=np.complex128)
        psi[0] = 1.0
        f = feats[bidx]
        for w in range(N_WIRES):
            psi = _embed1(_ry(f[w]), w) @ psi
        for w in range(N_WIRES):
            psi = _embed1(_rz(f[4 + w]), w) @ psi
        for w in range(N_WIRES):
            psi = _embed1(_rx(f[8 + w]), w) @ psi
        for w in range(N_WIRES):
            psi = _embed1(_ry(f[12 + w]), w) @ psi
        psi = U_ans @ psi
        out[bidx] = (np.abs(psi) ** 2) @ Z
    return out


if __name__ == "__main__":
    key = jax.random.PRNGKey(0)
    kx, kp = jax.random.split(key)

    BSZ = 2
    x = jax.random.normal(kx, (BSZ, 1, IMG, IMG), dtype=jnp.float32)
    # Trainable ansatz params: 8 blocks x {U3 layer (4 wires x 3), CU3 layer (4 pairs x 3)},
    # deterministic init uniform in [-pi, pi] (torchquantum's default init range).
    ansatz_params = jax.random.uniform(
        kp, (N_BLOCKS, 2, N_WIRES, 3), minval=-np.pi, maxval=np.pi, dtype=jnp.float32)

    params_np = np.asarray(ansatz_params, dtype=np.float64)
    consts = build_constants(params_np)

    out = quantum_classifier_forward(x, *consts)
    out = jax.block_until_ready(out)

    ref = reference_forward(np.asarray(x, dtype=np.float64), params_np)
    assert out.shape == (BSZ, N_WIRES)
    assert np.allclose(np.asarray(out), ref, atol=2e-3), (np.asarray(out), ref)

    # TODO(synk): the `use_qiskit=True` branch (QiskitProcessor hardware offload)
    # has no Pallas equivalent; only the state-vector simulator path is implemented.
    print("KERNEL_OK")
</pallas_src>

<mosaic_0001>
module attributes {stable_mosaic.version = 11 : i64} {
  func.func @quantum_classifier_kernel(%arg0: i32, %arg1: memref<8x784xf32, #tpu.memory_space<vmem>>, %arg2: memref<784x16xf32, #tpu.memory_space<vmem>>, %arg3: memref<16x16xf32, #tpu.memory_space<vmem>>, %arg4: memref<32x16xf32, #tpu.memory_space<vmem>>, %arg5: memref<32x16xf32, #tpu.memory_space<vmem>>, %arg6: memref<4x32xf32, #tpu.memory_space<vmem>>, %arg7: memref<16x4xf32, #tpu.memory_space<vmem>>, %arg8: memref<4x8xf32, #tpu.memory_space<vmem>>) attributes {dimension_semantics = [#tpu.dimension_semantics<parallel>], iteration_bounds = array<i64: 1>, scalar_prefetch = 0 : i64, scratch_operands = 0 : i64, tpu.core_type = #tpu.core_type<tc>, window_params = [{transform_indices = @transform_0, window_bounds = array<i64: 8, 784>}, {pipeline_mode = #tpu.pipeline_mode<synchronous>, transform_indices = @transform_1, window_bounds = array<i64: 784, 16>}, {pipeline_mode = #tpu.pipeline_mode<synchronous>, transform_indices = @transform_2, window_bounds = array<i64: 16, 16>}, {pipeline_mode = #tpu.pipeline_mode<synchronous>, transform_indices = @transform_3, window_bounds = array<i64: 32, 16>}, {pipeline_mode = #tpu.pipeline_mode<synchronous>, transform_indices = @transform_4, window_bounds = array<i64: 32, 16>}, {pipeline_mode = #tpu.pipeline_mode<synchronous>, transform_indices = @transform_5, window_bounds = array<i64: 4, 32>}, {pipeline_mode = #tpu.pipeline_mode<synchronous>, transform_indices = @transform_6, window_bounds = array<i64: 16, 4>}, {transform_indices = @transform_7, window_bounds = array<i64: 4, 8>}]} {
    %c0 = arith.constant 0 : index
    %c0_0 = arith.constant 0 : index
    %0 = vector.load %arg1[%c0, %c0_0] : memref<8x784xf32, #tpu.memory_space<vmem>>, vector<8x784xf32>
    %c0_1 = arith.constant 0 : index
    %c0_2 = arith.constant 0 : index
    %1 = vector.load %arg2[%c0_1, %c0_2] : memref<784x16xf32, #tpu.memory_space<vmem>>, vector<784x16xf32>
    %cst = arith.constant dense<0.000000e+00> : vector<8x16xf32>
    %2 = tpu.matmul %0, %1, %cst {dimension_numbers = #tpu.dot_dimension_numbers<[1], [0], [0], [1], [0, 0, 1, 1], [], []>} : vector<8x784xf32>, vector<784x16xf32>, vector<8x16xf32> -> vector<8x16xf32>
    %c0_3 = arith.constant 0 : index
    %c0_4 = arith.constant 0 : index
    %3 = vector.load %arg3[%c0_3, %c0_4] : memref<16x16xf32, #tpu.memory_space<vmem>>, vector<16x16xf32>
    %cst_5 = arith.constant dense<0.000000e+00> : vector<16x8xf32>
    %4 = tpu.matmul %3, %2, %cst_5 {dimension_numbers = #tpu.dot_dimension_numbers<[1], [1], [0], [0], [0, 0, 1, 0], [], []>} : vector<16x16xf32>, vector<8x16xf32>, vector<16x8xf32> -> vector<16x8xf32>
    %cst_6 = arith.constant 5.000000e-01 : f32
    %5 = vector.broadcast %cst_6 : f32 to vector<16x8xf32>
    %6 = arith.mulf %5, %4 : vector<16x8xf32>
    %7 = math.cos %6 : vector<16x8xf32>
    %cst_7 = arith.constant 5.000000e-01 : f32
    %8 = vector.broadcast %cst_7 : f32 to vector<16x8xf32>
    %9 = arith.mulf %8, %4 : vector<16x8xf32>
    %10 = math.sin %9 : vector<16x8xf32>
    %11 = vector.extract_strided_slice %7 {offsets = [0, 0], sizes = [4, 8], strides = [1, 1]} : vector<16x8xf32> to vector<4x8xf32>
    %12 = vector.extract_strided_slice %7 {offsets = [4, 0], sizes = [4, 8], strides = [1, 1]} : vector<16x8xf32> to vector<4x8xf32>
    %13 = vector.extract_strided_slice %7 {offsets = [8, 0], sizes = [4, 8], strides = [1, 1]} : vector<16x8xf32> to vector<4x8xf32>
    %14 = vector.extract_strided_slice %7 {offsets = [12, 0], sizes = [4, 8], strides = [1, 1]} : vector<16x8xf32> to vector<4x8xf32>
    %15 = vector.extract_strided_slice %10 {offsets = [0, 0], sizes = [4, 8], strides = [1, 1]} : vector<16x8xf32> to vector<4x8xf32>
    %16 = vector.extract_strided_slice %10 {offsets = [4, 0], sizes = [4, 8], strides = [1, 1]} : vector<16x8xf32> to vector<4x8xf32>
    %17 = vector.extract_strided_slice %10 {offsets = [8, 0], sizes = [4, 8], strides = [1, 1]} : vector<16x8xf32> to vector<4x8xf32>
    %18 = vector.extract_strided_slice %10 {offsets = [12, 0], sizes = [4, 8], strides = [1, 1]} : vector<16x8xf32> to vector<4x8xf32>
    %19 = arith.mulf %11, %12 : vector<4x8xf32>
    %20 = arith.mulf %11, %16 : vector<4x8xf32>
    %cst_8 = arith.constant 0.000000e+00 : f32
    %21 = vector.broadcast %cst_8 : f32 to vector<4x8xf32>
    %22 = arith.subf %21, %20 : vector<4x8xf32>
    %23 = arith.mulf %15, %12 : vector<4x8xf32>
    %24 = arith.mulf %15, %16 : vector<4x8xf32>
    %25 = arith.mulf %13, %19 : vector<4x8xf32>
    %26 = arith.mulf %17, %24 : vector<4x8xf32>
    %27 = arith.addf %25, %26 : vector<4x8xf32>
    %28 = arith.mulf %13, %22 : vector<4x8xf32>
    %29 = arith.mulf %17, %23 : vector<4x8xf32>
    %30 = arith.subf %28, %29 : vector<4x8xf32>
    %31 = arith.mulf %17, %22 : vector<4x8xf32>
    %32 = arith.mulf %13, %23 : vector<4x8xf32>
    %33 = arith.addf %31, %32 : vector<4x8xf32>
    %34 = arith.mulf %13, %24 : vector<4x8xf32>
    %35 = arith.mulf %17, %19 : vector<4x8xf32>
    %36 = arith.subf %34, %35 : vector<4x8xf32>
    %37 = arith.mulf %14, %27 : vector<4x8xf32>
    %38 = arith.mulf %18, %33 : vector<4x8xf32>
    %39 = arith.subf %37, %38 : vector<4x8xf32>
    %40 = arith.mulf %14, %30 : vector<4x8xf32>
    %41 = arith.mulf %18, %36 : vector<4x8xf32>
    %42 = arith.subf %40, %41 : vector<4x8xf32>
    %43 = arith.mulf %18, %27 : vector<4x8xf32>
    %44 = arith.mulf %14, %33 : vector<4x8xf32>
    %45 = arith.addf %43, %44 : vector<4x8xf32>
    %46 = arith.mulf %18, %30 : vector<4x8xf32>
    %47 = arith.mulf %14, %36 : vector<4x8xf32>
    %48 = arith.addf %46, %47 : vector<4x8xf32>
    %c0_9 = arith.constant 0 : index
    %c0_10 = arith.constant 0 : index
    %49 = vector.load %arg7[%c0_9, %c0_10] : memref<16x4xf32, #tpu.memory_space<vmem>>, vector<16x4xf32>
    %50 = vector.extract_strided_slice %49 {offsets = [0, 0], sizes = [16, 1], strides = [1, 1]} : vector<16x4xf32> to vector<16x1xf32>
    %51 = vector.extract_strided_slice %39 {offsets = [0, 0], sizes = [1, 8], strides = [1, 1]} : vector<4x8xf32> to vector<1x8xf32>
    %52 = vector.extract_strided_slice %45 {offsets = [0, 0], sizes = [1, 8], strides = [1, 1]} : vector<4x8xf32> to vector<1x8xf32>
    %53 = vector.extract_strided_slice %39 {offsets = [0, 0], sizes = [1, 8], strides = [1, 1]} : vector<4x8xf32> to vector<1x8xf32>
    %54 = arith.subf %52, %53 : vector<1x8xf32>
    %55 = vector.broadcast %50 : vector<16x1xf32> to vector<16x8xf32>
    %56 = vector.broadcast %54 : vector<1x8xf32> to vector<16x8xf32>
    %57 = arith.mulf %55, %56 : vector<16x8xf32>
    %58 = vector.broadcast %51 : vector<1x8xf32> to vector<16x8xf32>
    %59 = arith.addf %58, %57 : vector<16x8xf32>
    %60 = vector.extract_strided_slice %42 {offsets = [0, 0], sizes = [1, 8], strides = [1, 1]} : vector<4x8xf32> to vector<1x8xf32>
    %61 = vector.extract_strided_slice %48 {offsets = [0, 0], sizes = [1, 8], strides = [1, 1]} : vector<4x8xf32> to vector<1x8xf32>
    %62 = vector.extract_strided_slice %42 {offsets = [0, 0], sizes = [1, 8], strides = [1, 1]} : vector<4x8xf32> to vector<1x8xf32>
    %63 = arith.subf %61, %62 : vector<1x8xf32>
    %64 = vector.broadcast %50 : vector<16x1xf32> to vector<16x8xf32>
    %65 = vector.broadcast %63 : vector<1x8xf32> to vector<16x8xf32>
    %66 = arith.mulf %64, %65 : vector<16x8xf32>
    %67 = vector.broadcast %60 : vector<1x8xf32> to vector<16x8xf32>
    %68 = arith.addf %67, %66 : vector<16x8xf32>
    %69 = vector.extract_strided_slice %49 {offsets = [0, 1], sizes = [16, 1], strides = [1, 1]} : vector<16x4xf32> to vector<16x1xf32>
    %70 = vector.extract_strided_slice %39 {offsets = [1, 0], sizes = [1, 8], strides = [1, 1]} : vector<4x8xf32> to vector<1x8xf32>
    %71 = vector.extract_strided_slice %45 {offsets = [1, 0], sizes = [1, 8], strides = [1, 1]} : vector<4x8xf32> to vector<1x8xf32>
    %72 = vector.extract_strided_slice %39 {offsets = [1, 0], sizes = [1, 8], strides = [1, 1]} : vector<4x8xf32> to vector<1x8xf32>
    %73 = arith.subf %71, %72 : vector<1x8xf32>
    %74 = vector.broadcast %69 : vector<16x1xf32> to vector<16x8xf32>
    %75 = vector.broadcast %73 : vector<1x8xf32> to vector<16x8xf32>
    %76 = arith.mulf %74, %75 : vector<16x8xf32>
    %77 = vector.broadcast %70 : vector<1x8xf32> to vector<16x8xf32>
    %78 = arith.addf %77, %76 : vector<16x8xf32>
    %79 = vector.extract_strided_slice %42 {offsets = [1, 0], sizes = [1, 8], strides = [1, 1]} : vector<4x8xf32> to vector<1x8xf32>
    %80 = vector.extract_strided_slice %48 {offsets = [1, 0], sizes = [1, 8], strides = [1, 1]} : vector<4x8xf32> to vector<1x8xf32>
    %81 = vector.extract_strided_slice %42 {offsets = [1, 0], sizes = [1, 8], strides = [1, 1]} : vector<4x8xf32> to vector<1x8xf32>
    %82 = arith.subf %80, %81 : vector<1x8xf32>
    %83 = vector.broadcast %69 : vector<16x1xf32> to vector<16x8xf32>
    %84 = vector.broadcast %82 : vector<1x8xf32> to vector<16x8xf32>
    %85 = arith.mulf %83, %84 : vector<16x8xf32>
    %86 = vector.broadcast %79 : vector<1x8xf32> to vector<16x8xf32>
    %87 = arith.addf %86, %85 : vector<16x8xf32>
    %88 = arith.mulf %59, %78 : vector<16x8xf32>
    %89 = arith.mulf %68, %87 : vector<16x8xf32>
    %90 = arith.subf %88, %89 : vector<16x8xf32>
    %91 = arith.mulf %59, %87 : vector<16x8xf32>
    %92 = arith.mulf %68, %78 : vector<16x8xf32>
    %93 = arith.addf %91, %92 : vector<16x8xf32>
    %94 = vector.extract_strided_slice %49 {offsets = [0, 2], sizes = [16, 1], strides = [1, 1]} : vector<16x4xf32> to vector<16x1xf32>
    %95 = vector.extract_strided_slice %39 {offsets = [2, 0], sizes = [1, 8], strides = [1, 1]} : vector<4x8xf32> to vector<1x8xf32>
    %96 = vector.extract_strided_slice %45 {offsets = [2, 0], sizes = [1, 8], strides = [1, 1]} : vector<4x8xf32> to vector<1x8xf32>
    %97 = vector.extract_strided_slice %39 {offsets = [2, 0], sizes = [1, 8], strides = [1, 1]} : vector<4x8xf32> to vector<1x8xf32>
    %98 = arith.subf %96, %97 : vector<1x8xf32>
    %99 = vector.broadcast %94 : vector<16x1xf32> to vector<16x8xf32>
    %100 = vector.broadcast %98 : vector<1x8xf32> to vector<16x8xf32>
    %101 = arith.mulf %99, %100 : vector<16x8xf32>
    %102 = vector.broadcast %95 : vector<1x8xf32> to vector<16x8xf32>
    %103 = arith.addf %102, %101 : vector<16x8xf32>
    %104 = vector.extract_strided_slice %42 {offsets = [2, 0], sizes = [1, 8], strides = [1, 1]} : vector<4x8xf32> to vector<1x8xf32>
    %105 = vector.extract_strided_slice %48 {offsets = [2, 0], sizes = [1, 8], strides = [1, 1]} : vector<4x8xf32> to vector<1x8xf32>
    %106 = vector.extract_strided_slice %42 {offsets = [2, 0], sizes = [1, 8], strides = [1, 1]} : vector<4x8xf32> to vector<1x8xf32>
    %107 = arith.subf %105, %106 : vector<1x8xf32>
    %108 = vector.broadcast %94 : vector<16x1xf32> to vector<16x8xf32>
    %109 = vector.broadcast %107 : vector<1x8xf32> to vector<16x8xf32>
    %110 = arith.mulf %108, %109 : vector<16x8xf32>
    %111 = vector.broadcast %104 : vector<1x8xf32> to vector<16x8xf32>
    %112 = arith.addf %111, %110 : vector<16x8xf32>
    %113 = arith.mulf %90, %103 : vector<16x8xf32>
    %114 = arith.mulf %93, %112 : vector<16x8xf32>
    %115 = arith.subf %113, %114 : vector<16x8xf32>
    %116 = arith.mulf %90, %112 : vector<16x8xf32>
    %117 = arith.mulf %93, %103 : vector<16x8xf32>
    %118 = arith.addf %116, %117 : vector<16x8xf32>
    %119 = vector.extract_strided_slice %49 {offsets = [0, 3], sizes = [16, 1], strides = [1, 1]} : vector<16x4xf32> to vector<16x1xf32>
    %120 = vector.extract_strided_slice %39 {offsets = [3, 0], sizes = [1, 8], strides = [1, 1]} : vector<4x8xf32> to vector<1x8xf32>
    %121 = vector.extract_strided_slice %45 {offsets = [3, 0], sizes = [1, 8], strides = [1, 1]} : vector<4x8xf32> to vector<1x8xf32>
    %122 = vector.extract_strided_slice %39 {offsets = [3, 0], sizes = [1, 8], strides = [1, 1]} : vector<4x8xf32> to vector<1x8xf32>
    %123 = arith.subf %121, %122 : vector<1x8xf32>
    %124 = vector.broadcast %119 : vector<16x1xf32> to vector<16x8xf32>
    %125 = vector.broadcast %123 : vector<1x8xf32> to vector<16x8xf32>
    %126 = arith.mulf %124, %125 : vector<16x8xf32>
    %127 = vector.broadcast %120 : vector<1x8xf32> to vector<16x8xf32>
    %128 = arith.addf %127, %126 : vector<16x8xf32>
    %129 = vector.extract_strided_slice %42 {offsets = [3, 0], sizes = [1, 8], strides = [1, 1]} : vector<4x8xf32> to vector<1x8xf32>
    %130 = vector.extract_strided_slice %48 {offsets = [3, 0], sizes = [1, 8], strides = [1, 1]} : vector<4x8xf32> to vector<1x8xf32>
    %131 = vector.extract_strided_slice %42 {offsets = [3, 0], sizes = [1, 8], strides = [1, 1]} : vector<4x8xf32> to vector<1x8xf32>
    %132 = arith.subf %130, %131 : vector<1x8xf32>
    %133 = vector.broadcast %119 : vector<16x1xf32> to vector<16x8xf32>
    %134 = vector.broadcast %132 : vector<1x8xf32> to vector<16x8xf32>
    %135 = arith.mulf %133, %134 : vector<16x8xf32>
    %136 = vector.broadcast %129 : vector<1x8xf32> to vector<16x8xf32>
    %137 = arith.addf %136, %135 : vector<16x8xf32>
    %138 = arith.mulf %115, %128 : vector<16x8xf32>
    %139 = arith.mulf %118, %137 : vector<16x8xf32>
    %140 = arith.subf %138, %139 : vector<16x8xf32>
    %141 = arith.mulf %115, %137 : vector<16x8xf32>
    %142 = arith.mulf %118, %128 : vector<16x8xf32>
    %143 = arith.addf %141, %142 : vector<16x8xf32>
    %c0_11 = arith.constant 0 : index
    %c0_12 = arith.constant 0 : index
    %144 = vector.load %arg4[%c0_11, %c0_12] : memref<32x16xf32, #tpu.memory_space<vmem>>, vector<32x16xf32>
    %cst_13 = arith.constant dense<0.000000e+00> : vector<32x8xf32>
    %145 = tpu.matmul %144, %140, %cst_13 {dimension_numbers = #tpu.dot_dimension_numbers<[1], [0], [0], [1], [0, 0, 1, 1], [], []>} : vector<32x16xf32>, vector<16x8xf32>, vector<32x8xf32> -> vector<32x8xf32>
    %c0_14 = arith.constant 0 : index
    %c0_15 = arith.constant 0 : index
    %146 = vector.load %arg5[%c0_14, %c0_15] : memref<32x16xf32, #tpu.memory_space<vmem>>, vector<32x16xf32>
    %cst_16 = arith.constant dense<0.000000e+00> : vector<32x8xf32>
    %147 = tpu.matmul %146, %143, %cst_16 {dimension_numbers = #tpu.dot_dimension_numbers<[1], [0], [0], [1], [0, 0, 1, 1], [], []>} : vector<32x16xf32>, vector<16x8xf32>, vector<32x8xf32> -> vector<32x8xf32>
    %148 = arith.addf %145, %147 : vector<32x8xf32>
    %c0_17 = arith.constant 0 : index
    %c0_18 = arith.constant 0 : index
    %149 = vector.load %arg6[%c0_17, %c0_18] : memref<4x32xf32, #tpu.memory_space<vmem>>, vector<4x32xf32>
    %150 = arith.mulf %148, %148 : vector<32x8xf32>
    %cst_19 = arith.constant dense<0.000000e+00> : vector<4x8xf32>
    %151 = tpu.matmul %149, %150, %cst_19 {dimension_numbers = #tpu.dot_dimension_numbers<[1], [0], [0], [1], [0, 0, 1, 1], [], []>} : vector<4x32xf32>, vector<32x8xf32>, vector<4x8xf32> -> vector<4x8xf32>
    %c0_20 = arith.constant 0 : index
    %c0_21 = arith.constant 0 : index
    %152 = vector.load %arg8[%c0_20, %c0_21] : memref<4x8xf32, #tpu.memory_space<vmem>>, vector<4x8xf32>
    tpu.vector_store %arg8[%c0_20, %c0_21], %151 {strides = array<i32>} : memref<4x8xf32, #tpu.memory_space<vmem>>, vector<4x8xf32>,
    return
  }
  func.func @transform_0(%arg0: i32) -> (i32, i32) {
    %c0_i32 = arith.constant 0 : i32
    %c0_i32_0 = arith.constant 0 : i32
    return %arg0, %c0_i32 : i32, i32
  }
  func.func @transform_1(%arg0: i32) -> (i32, i32) {
    %c0_i32 = arith.constant 0 : i32
    %c0_i32_0 = arith.constant 0 : i32
    %c0_i32_1 = arith.constant 0 : i32
    return %c0_i32, %c0_i32_0 : i32, i32
  }
  func.func @transform_2(%arg0: i32) -> (i32, i32) {
    %c0_i32 = arith.constant 0 : i32
    %c0_i32_0 = arith.constant 0 : i32
    %c0_i32_1 = arith.constant 0 : i32
    return %c0_i32, %c0_i32_0 : i32, i32
  }
  func.func @transform_3(%arg0: i32) -> (i32, i32) {
    %c0_i32 = arith.constant 0 : i32
    %c0_i32_0 = arith.constant 0 : i32
    %c0_i32_1 = arith.constant 0 : i32
    return %c0_i32, %c0_i32_0 : i32, i32
  }
  func.func @transform_4(%arg0: i32) -> (i32, i32) {
    %c0_i32 = arith.constant 0 : i32
    %c0_i32_0 = arith.constant 0 : i32
    %c0_i32_1 = arith.constant 0 : i32
    return %c0_i32, %c0_i32_0 : i32, i32
  }
  func.func @transform_5(%arg0: i32) -> (i32, i32) {
    %c0_i32 = arith.constant 0 : i32
    %c0_i32_0 = arith.constant 0 : i32
    %c0_i32_1 = arith.constant 0 : i32
    return %c0_i32, %c0_i32_0 : i32, i32
  }
  func.func @transform_6(%arg0: i32) -> (i32, i32) {
    %c0_i32 = arith.constant 0 : i32
    %c0_i32_0 = arith.constant 0 : i32
    %c0_i32_1 = arith.constant 0 : i32
    return %c0_i32, %c0_i32_0 : i32, i32
  }
  func.func @transform_7(%arg0: i32) -> (i32, i32) {
    %c0_i32 = arith.constant 0 : i32
    %c0_i32_0 = arith.constant 0 : i32
    return %c0_i32, %arg0 : i32, i32
  }
}

</mosaic_0001>

<bundles_post_ra>
// kernel: quantum_classifier_forward.1
= control target key start
LH: loop header
LB: loop body
LE: loop exit
PB: predicated region body
PF: predicated region fallthrough
CT: control target
= control target key end

     0   :  { %vm131_vm0 = vcmask 130048   ;;  %s1872_s1 = inlined_call_operand.vmem [shape: f32[784,16], index: 1, kind: input, shape index: {}]   ;;  %s1873_s0 = inlined_call_operand.vmem [shape: f32[8,784], index: 0, kind: input, shape index: {}]   ;;  %s1874_s6 = inlined_call_operand.vmem [shape: f32[16,4], index: 6, kind: input, shape index: {}]   ;;  %s1875_s2 = inlined_call_operand.vmem [shape: f32[16,16], index: 2, kind: input, shape index: {}]   ;;  %s1876_s4 = inlined_call_operand.vmem [shape: f32[32,16], index: 4, kind: input, shape index: {}]   ;;  %s1877_s3 = inlined_call_operand.vmem [shape: f32[32,16], index: 3, kind: input, shape index: {}]   ;;  %s1878_s5 = inlined_call_operand.vmem [shape: f32[4,32], index: 5, kind: input, shape index: {}]   ;;  %s1879_s7 = inlined_call_operand.vmem [shape: f32[4,8], index: 7, kind: output, shape index: {}]  }
   0x1   :  { %v48_v0 = vld [vmem:[%s1872_s1 + $0x78] sm:$0xff]  ;;  %v47_v1 = vld [vmem:[%s1872_s1 + $0x70] sm:$0xff]  ;;  %v46_v4 = vld [vmem:[%s1872_s1 + $0x68] sm:$0xff] }
   0x2   :  { %v64_v2 = vld [vmem:[%s1872_s1 + $0xf8] sm:$0xff]  ;;  %135 = vmatpush.msra.mxu0 %v48_v0  ;;  %v63_v3 = vld [vmem:[%s1872_s1 + $0xf0] sm:$0xff]  ;;  %v62_v5 = vld [vmem:[%s1872_s1 + $0xe8] sm:$0xff] }
   0x3   :  { %155 = vmatpush.msra.mxu1 %v64_v2  ;;  %v45_v6 = vld [vmem:[%s1872_s1 + $0x60] sm:$0xff]  ;;  %v44_v8 = vld [vmem:[%s1872_s1 + $0x58] sm:$0xff]  ;;  %v79_v11 = vld [vmem:[%s1872_s1 + $0x170] sm:$0xff] }
   0x4   :  { %136 = vmatpush.msra.mxu0 %v47_v1  ;;  %v61_v7 = vld [vmem:[%s1872_s1 + $0xe0] sm:$0xff]  ;;  %v60_v9 = vld [vmem:[%s1872_s1 + $0xd8] sm:$0xff]  ;;  %v43_v13 = vld [vmem:[%s1872_s1 + $0x50] sm:$0xff] }
   0x5   :  { %156 = vmatpush.msra.mxu1 %v63_v3  ;;  %v80_v10 = vld [vmem:[%s1872_s1 + $0x178] sm:$0xff]  ;;  %v59_v14 = vld [vmem:[%s1872_s1 + $0xd0] sm:$0xff]  ;;  %v78_v15 = vld [vmem:[%s1872_s1 + $0x168] sm:$0xff] }
   0x6   :  { %137 = vmatpush.msra.mxu0 %v46_v4  ;;  %v96_v12 = vld [vmem:[%s1872_s1 + $0x1f8] sm:$0xff]  ;;  %175 = vmatpush.msra.mxu2 %v80_v10  ;;  %v95_v16 = vld [vmem:[%s1872_s1 + $0x1f0] sm:$0xff]  ;;  %v42_v17 = vld [vmem:[%s1872_s1 + $0x48] sm:$0xff] }
   0x7   :  { %157 = vmatpush.msra.mxu1 %v62_v5  ;;  %195 = vmatpush.msra.mxu3 %v96_v12  ;;  %v58_v18 = vld [vmem:[%s1872_s1 + $0xc8] sm:$0xff]  ;;  %v77_v20 = vld [vmem:[%s1872_s1 + $0x160] sm:$0xff]  ;;  %v76_v24 = vld [vmem:[%s1872_s1 + $0x158] sm:$0xff] }
   0x8   :  { %138 = vmatpush.msra.mxu0 %v45_v6  ;;  %176 = vmatpush.msra.mxu2 %v79_v11  ;;  %v94_v19 = vld [vmem:[%s1872_s1 + $0x1e8] sm:$0xff]  ;;  %v93_v21 = vld [vmem:[%s1872_s1 + $0x1e0] sm:$0xff]  ;;  %v92_v25 = vld [vmem:[%s1872_s1 + $0x1d8] sm:$0xff] }
   0x9   :  { %158 = vmatpush.msra.mxu1 %v61_v7  ;;  %196 = vmatpush.msra.mxu3 %v95_v16  ;;  %v41_v22 = vld [vmem:[%s1872_s1 + $0x40] sm:$0xff]  ;;  %v40_v26 = vld [vmem:[%s1872_s1 + $0x38] sm:$0xff]  ;;  %v75_v28 = vld [vmem:[%s1872_s1 + $0x150] sm:$0xff] }
   0xa   :  { %139 = vmatpush.msra.mxu0 %v44_v8  ;;  %v57_v23 = vld [vmem:[%s1872_s1 + $0xc0] sm:$0xff]  ;;  %177 = vmatpush.msra.mxu2 %v78_v15  ;;  %v56_v27 = vld [vmem:[%s1872_s1 + $0xb8] sm:$0xff]  ;;  %v91_v29 = vld [vmem:[%s1872_s1 + $0x1d0] sm:$0xff] }
   0xb   :  { %159 = vmatpush.msra.mxu1 %v60_v9  ;;  %197 = vmatpush.msra.mxu3 %v94_v19  ;;  %v39_v30 = vld [vmem:[%s1872_s1 + $0x30] sm:$0xff]  ;;  %v74_v32 = vld [vmem:[%s1872_s1 + $0x148] sm:$0xff]  ;;  %v73_v36 = vld [vmem:[%s1872_s1 + $0x140] sm:$0xff] }
   0xc   :  { %140 = vmatpush.msra.mxu0 %v43_v13  ;;  %178 = vmatpush.msra.mxu2 %v77_v20  ;;  %v55_v31 = vld [vmem:[%s1872_s1 + $0xb0] sm:$0xff]  ;;  %v90_v33 = vld [vmem:[%s1872_s1 + $0x1c8] sm:$0xff]  ;;  %v89_v37 = vld [vmem:[%s1872_s1 + $0x1c0] sm:$0xff] }
   0xd   :  { %160 = vmatpush.msra.mxu1 %v59_v14  ;;  %198 = vmatpush.msra.mxu3 %v93_v21  ;;  %v38_v34 = vld [vmem:[%s1872_s1 + $0x28] sm:$0xff]  ;;  %v37_v38 = vld [vmem:[%s1872_s1 + $0x20] sm:$0xff]  ;;  %v72_v40 = vld [vmem:[%s1872_s1 + $0x138] sm:$0xff] }
   0xe   :  { %141 = vmatpush.msra.mxu0 %v42_v17  ;;  %179 = vmatpush.msra.mxu2 %v76_v24  ;;  %v54_v35 = vld [vmem:[%s1872_s1 + $0xa8] sm:$0xff]  ;;  %v53_v39 = vld [vmem:[%s1872_s1 + $0xa0] sm:$0xff]  ;;  %v88_v41 = vld [vmem:[%s1872_s1 + $0x1b8] sm:$0xff] }
   0xf   :  { %161 = vmatpush.msra.mxu1 %v58_v18  ;;  %199 = vmatpush.msra.mxu3 %v92_v25  ;;  %v36_v42 = vld [vmem:[%s1872_s1 + $0x18] sm:$0xff]  ;;  %v71_v44 = vld [vmem:[%s1872_s1 + $0x130] sm:$0xff]  ;;  %v70_v48 = vld [vmem:[%s1872_s1 + $0x128] sm:$0xff] }
  0x10   :  { %142 = vmatpush.msra.mxu0 %v41_v22  ;;  %180 = vmatpush.msra.mxu2 %v75_v28  ;;  %v52_v43 = vld [vmem:[%s1872_s1 + $0x98] sm:$0xff]  ;;  %v87_v45 = vld [vmem:[%s1872_s1 + $0x1b0] sm:$0xff]  ;;  %v86_v49 = vld [vmem:[%s1872_s1 + $0x1a8] sm:$0xff] }
  0x11   :  { %162 = vmatpush.msra.mxu1 %v57_v23  ;;  %200 = vmatpush.msra.mxu3 %v91_v29  ;;  %v35_v46 = vld [vmem:[%s1872_s1 + $0x10] sm:$0xff]  ;;  %v34_v50 = vld [vmem:[%s1872_s1 + $0x8] sm:$0xff]  ;;  %v69_v52 = vld [vmem:[%s1872_s1 + $0x120] sm:$0xff] }
  0x12   :  { %143 = vmatpush.msra.mxu0 %v40_v26  ;;  %181 = vmatpush.msra.mxu2 %v74_v32  ;;  %v51_v47 = vld [vmem:[%s1872_s1 + $0x90] sm:$0xff]  ;;  %v50_v51 = vld [vmem:[%s1872_s1 + $0x88] sm:$0xff]  ;;  %v85_v53 = vld [vmem:[%s1872_s1 + $0x1a0] sm:$0xff] }
  0x13   :  { %163 = vmatpush.msra.mxu1 %v56_v27  ;;  %201 = vmatpush.msra.mxu3 %v90_v33  ;;  %v33_v54 = vld [vmem:[%s1872_s1] sm:$0xff]  ;;  %v112_v56 = vld [vmem:[%s1872_s1 + $0x278] sm:$0xff]  ;;  %v111_v60 = vld [vmem:[%s1872_s1 + $0x270] sm:$0xff] }
  0x14   :  { %144 = vmatpush.msra.mxu0 %v39_v30  ;;  %182 = vmatpush.msra.mxu2 %v73_v36  ;;  %v49_v55 = vld [vmem:[%s1872_s1 + $0x80] sm:$0xff]  ;;  %v128_v57 = vld [vmem:[%s1872_s1 + $0x2f8] sm:$0xff]  ;;  %v127_v61 = vld [vmem:[%s1872_s1 + $0x2f0] sm:$0xff] }
  0x15   :  { %164 = vmatpush.msra.mxu1 %v55_v31  ;;  %202 = vmatpush.msra.mxu3 %v89_v37  ;;  %v68_v58 = vld [vmem:[%s1872_s1 + $0x118] sm:$0xff]  ;;  %v67_v62 = vld [vmem:[%s1872_s1 + $0x110] sm:$0xff]  ;;  %v110_v0 = vld [vmem:[%s1872_s1 + $0x268] sm:$0xff] }
  0x16   :  { %145 = vmatpush.msra.mxu0 %v38_v34  ;;  %183 = vmatpush.msra.mxu2 %v72_v40  ;;  %v84_v59 = vld [vmem:[%s1872_s1 + $0x198] sm:$0xff]  ;;  %v83_v63 = vld [vmem:[%s1872_s1 + $0x190] sm:$0xff]  ;;  %v126_v1 = vld [vmem:[%s1872_s1 + $0x2e8] sm:$0xff] }
  0x17   :  { %165 = vmatpush.msra.mxu1 %v54_v35  ;;  %203 = vmatpush.msra.mxu3 %v88_v41  ;;  %v66_v2 = vld [vmem:[%s1872_s1 + $0x108] sm:$0xff]  ;;  %v109_v4 = vld [vmem:[%s1872_s1 + $0x260] sm:$0xff]  ;;  %v108_v8 = vld [vmem:[%s1872_s1 + $0x258] sm:$0xff] }
  0x18   :  { %146 = vmatpush.msra.mxu0 %v37_v38  ;;  %184 = vmatpush.msra.mxu2 %v71_v44  ;;  %v82_v3 = vld [vmem:[%s1872_s1 + $0x188] sm:$0xff]  ;;  %v125_v5 = vld [vmem:[%s1872_s1 + $0x2e0] sm:$0xff]  ;;  %v124_v9 = vld [vmem:[%s1872_s1 + $0x2d8] sm:$0xff] }
  0x19   :  { %166 = vmatpush.msra.mxu1 %v53_v39  ;;  %204 = vmatpush.msra.mxu3 %v87_v45  ;;  %v65_v6 = vld [vmem:[%s1872_s1 + $0x100] sm:$0xff]  ;;  %v28_v10 = vld [vmem:[%s1873_s0 + $0x10] sm:$0xff]  ;;  %v29_v11 = vld [vmem:[%s1873_s0 + $0x18] sm:$0xff] }
  0x1a   :  { %147 = vmatpush.msra.mxu0 %v36_v42  ;;  %185 = vmatpush.msra.mxu2 %v70_v48  ;;  %v81_v7 = vld [vmem:[%s1872_s1 + $0x180] sm:$0xff]  ;;  %v107_v12 = vld [vmem:[%s1872_s1 + $0x250] sm:$0xff]  ;;  %v27_v15 = vld [vmem:[%s1873_s0 + $0x8] sm:$0xff] }
  0x1b   :  { %167 = vmatpush.msra.mxu1 %v52_v43  ;;  %205 = vmatpush.msra.mxu3 %v86_v49  ;;  %v123_v13 = vld [vmem:[%s1872_s1 + $0x2d0] sm:$0xff]  ;;  %v26_v14 = vld [vmem:[%s1873_s0] sm:$0xff]  ;;  %v106_v16 = vld [vmem:[%s1872_s1 + $0x248] sm:$0xff]  ;;  %v1267_v43 = vmov 0  }
  0x1c   :  { %148 = vmatpush.msra.mxu0 %v35_v46  ;;  %186 = vmatpush.msra.mxu2 %v69_v52  ;;  %v122_v17 = vld [vmem:[%s1872_s1 + $0x2c8] sm:$0xff]  ;;  %v105_v19 = vld [vmem:[%s1872_s1 + $0x240] sm:$0xff]  ;;  %v104_v22 = vld [vmem:[%s1872_s1 + $0x238] sm:$0xff]  ;;  %v1268_v46 = vmov 1  }
  0x1d   :  { %168 = vmatpush.msra.mxu1 %v51_v47  ;;  %206 = vmatpush.msra.mxu3 %v85_v53  ;;  %v130_v18 = vld [vmem:[%s1872_s1 + $0x308] sm:$0xff]  ;;  %v121_v20 = vld [vmem:[%s1872_s1 + $0x2c0] sm:$0xff]  ;;  %v120_v23 = vld [vmem:[%s1872_s1 + $0x2b8] sm:$0xff] }
  0x1e   :  { %149 = vmatpush.msra.mxu0 %v34_v50  ;;  %187 = vmatpush.msra.mxu2 %v68_v58  ;;  %v129_v21 = vld [vmem:[%s1872_s1 + $0x300] sm:$0xff]  ;;  %v32_v24 = vld [vmem:[%s1873_s0 + $0x30] sm:$0xff]  ;;  %v102_v27 = vld [vmem:[%s1872_s1 + $0x228] sm:$0xff] }
  0x1f   :  { %169 = vmatpush.msra.mxu1 %v50_v51  ;;  %207 = vmatpush.msra.mxu3 %v84_v59  ;;  %v103_v25 = vld [vmem:[%s1872_s1 + $0x230] sm:$0xff]  ;;  %v118_v28 = vld [vmem:[%s1872_s1 + $0x2a8] sm:$0xff]  ;;  %v101_v29 = vld [vmem:[%s1872_s1 + $0x220] sm:$0xff] }
  0x20   :  { %150 = vmatpush.msra.mxu0 %v33_v54  ;;  %188 = vmatpush.msra.mxu2 %v67_v62  ;;  %v119_v26 = vld [vmem:[%s1872_s1 + $0x2b0] sm:$0xff]  ;;  %v117_v30 = vld [vmem:[%s1872_s1 + $0x2a0] sm:$0xff]  ;;  %v100_v31 = vld [vmem:[%s1872_s1 + $0x218] sm:$0xff] }
  0x21   :  { %170 = vmatpush.msra.mxu1 %v49_v55  ;;  %208 = vmatpush.msra.mxu3 %v83_v63  ;;  %v116_v32 = vld [vmem:[%s1872_s1 + $0x298] sm:$0xff]  ;;  %v99_v33 = vld [vmem:[%s1872_s1 + $0x210] sm:$0xff]  ;;  %v98_v35 = vld [vmem:[%s1872_s1 + $0x208] sm:$0xff] }
  0x22   :  { %215 = vmatpush.msrb.mxu0 %v112_v56  ;;  %189 = vmatpush.msra.mxu2 %v66_v2  ;;  %v115_v34 = vld [vmem:[%s1872_s1 + $0x290] sm:$0xff]  ;;  %v114_v36 = vld [vmem:[%s1872_s1 + $0x288] sm:$0xff]  ;;  %v97_v37 = vld [vmem:[%s1872_s1 + $0x200] sm:$0xff] }
  0x23   :  { %235 = vmatpush.msrb.mxu1 %v128_v57  ;;  %209 = vmatpush.msra.mxu3 %v82_v3  ;;  %v113_v38 = vld [vmem:[%s1872_s1 + $0x280] sm:$0xff]  ;;  %v31_v40 = vld [vmem:[%s1873_s0 + $0x28] sm:$0xff]  ;;  %v1270_v3 = vmov 2  }
  0x24   :  { %216 = vmatpush.msrb.mxu0 %v111_v60  ;;  %190 = vmatpush.msra.mxu2 %v65_v6  ;;  %v30_v39 = vld [vmem:[%s1873_s0 + $0x20] sm:$0xff]  ;;  %v977_v42 = vld [vmem:[%s1874_s6 + $0x8] sm:$0xff]  ;;  %v1269_v60 = vmov 3  }
  0x25   :  { %236 = vmatpush.msrb.mxu1 %v127_v61  ;;  %210 = vmatpush.msra.mxu3 %v81_v7  ;;  %v1636_v41 = vld [vmem:[%s1874_s6] sm:$0xff]  ;;  %v276_v59 = vld [vmem:[%s1875_s2 + $0x8] sm:$0xff] }
  0x26   :  { %217 = vmatpush.msrb.mxu0 %v110_v0  ;;  %191 = vmatmul.f32.vlgmr.msra.gmra.mxu2 %v28_v10  ;;  %v275_v58 = vld [vmem:[%s1875_s2] sm:$0xff] }
  0x27   :  { %237 = vmatpush.msrb.mxu1 %v126_v1  ;;  %211 = vmatmul.f32.vlgmr.msra.gmra.mxu3 %v29_v11 }
  0x28   :  { %218 = vmatpush.msrb.mxu0 %v109_v4  ;;  %171 = vmatmul.f32.vlgmr.msra.gmra.mxu1 %v27_v15 }
  0x29   :  { %238 = vmatpush.msrb.mxu1 %v125_v5  ;;  %151 = vmatmul.f32.vlgmr.msra.gmra.mxu0 %v26_v14 }
  0x2a   :  { %219 = vmatpush.msrb.mxu0 %v108_v8  ;;  %269 = vmatpush.msrb.mxu2 %v130_v18 }
  0x2b   :  { %239 = vmatpush.msrb.mxu1 %v124_v9  ;;  %1261 = vset.pattern.permute.xlu1 %v1267_v43 }
  0x2c   :  { %220 = vmatpush.msrb.mxu0 %v107_v12  ;;  %270 = vmatpush.msrb.mxu2 %v129_v21 }
  0x2d   :  { %240 = vmatpush.msrb.mxu1 %v123_v13  ;;  %1259 = vset.pattern.permute.xlu0 %v1267_v43 }
  0x2e   :  { %221 = vmatpush.msrb.mxu0 %v106_v16  ;;  %1223 = vmatmul.msk.f32.vlgmr.msrb.gmra.mxu2 %vm131_vm0, %v32_v24  ;;  %v1273_v24 = vmov 2131351028  }
  0x2f   :  { %241 = vmatpush.msrb.mxu1 %v122_v17  ;;  %981 = vperm.xlu1 %1261, %v1636_v41  }
  0x30   :  { %222 = vmatpush.msrb.mxu0 %v105_v19  ;;  %986 = vperm.xlu0 %1259, %v977_v42  }
  0x31   :  { %242 = vmatpush.msrb.mxu1 %v121_v20  ;;  %1263 = vset.pattern.permute.xlu2 %v1270_v3  ;;  %v1271_v20 = vmov 683565275  }
  0x32   :  { %223 = vmatpush.msrb.mxu0 %v104_v22  ;;  %1039 = vperm.xlu2 %1263, %v977_v42   ;;  %v1272_v22 = vmov 2475754826  }
  0x33   :  { %243 = vmatpush.msrb.mxu1 %v120_v23 }
  0x34   :  { %224 = vmatpush.msrb.mxu0 %v103_v25 }
  0x35   :  { %244 = vmatpush.msrb.mxu1 %v119_v26 }
  0x36   :  { %225 = vmatpush.msrb.mxu0 %v102_v27 }
  0x37   :  { %245 = vmatpush.msrb.mxu1 %v118_v28  ;;  %1262 = vset.pattern.permute.xlu1 %v1268_v46 }
  0x38   :  { %226 = vmatpush.msrb.mxu0 %v101_v29  ;;  %1260 = vset.pattern.permute.xlu0 %v1268_v46  ;;  %v1274_v29 = vmov 2102212464  }
  0x39   :  { %246 = vmatpush.msrb.mxu1 %v117_v30  ;;  %1003 = vperm.xlu1 %1262, %v1636_v41  }
  0x3a   :  { %227 = vmatpush.msrb.mxu0 %v100_v31  ;;  %1007 = vperm.xlu0 %1260, %v977_v42  }
  0x3b   :  { %247 = vmatpush.msrb.mxu1 %v116_v32  ;;  %1035 = vperm.xlu2 %1263, %v1636_v41   ;;  %v1275_v32 = vmov 920167782  }
  0x3c   :  { %228 = vmatpush.msrb.mxu0 %v99_v33 }
  0x3d   :  { %248 = vmatpush.msrb.mxu1 %v115_v34 }
  0x3e   :  { %229 = vmatpush.msrb.mxu0 %v98_v35  ;;  %v1276_v35 = vmov 1326507024  }
  0x3f   :  { %249 = vmatpush.msrb.mxu1 %v114_v36 }
  0x40   :  { %230 = vmatpush.msrb.mxu0 %v97_v37 }
  0x41   :  { %250 = vmatpush.msrb.mxu1 %v113_v38  ;;  %231 = vmatmul.f32.vlgmr.msrb.gmra.mxu0 %v30_v39 }
  0x42   :  { %251 = vmatmul.f32.vlgmr.msrb.gmra.mxu1 %v31_v40  ;;  %1264 = vset.pattern.permute.xlu1 %v1269_v60 }
  0x43   :  { %1266 = vset.pattern.permute.xlu0 %v1269_v60  ;;  %1071 = vperm.xlu1 %1264, %v977_v42  }
  0x44   :  { %1265 = vset.pattern.permute.xlu2 %v1269_v60 }
  0x45   :  { %1067 = vperm.xlu2 %1265, %v1636_v41  }
  0xa5   :  { %v172_v45 = vpop.f32.mrf.mxu1 }
  0xa6   :  { %v152_v44 = vpop.f32.mrf.mxu0 }
  0xa7   :  { %v173_v47 = vadd.f32 %v172_v45, %v152_v44 }
  0xa9   :  { %v192_v48 = vpop.f32.mrf.mxu2 }
  0xaa   :  { %v193_v49 = vadd.f32 %v192_v48, %v173_v47  ;;  %v212_v50 = vpop.f32.mrf.mxu3 }
  0xac   :  { %v213_v51 = vadd.f32 %v212_v50, %v193_v49 }
  0xb1   :  { %v272_v55 = vpop.f32.mrf.mxu2 }
  0xbe   :  { %v232_v52 = vpop.f32.mrf.mxu0 }
  0xbf   :  { %v252_v53 = vpop.f32.mrf.mxu1  ;;  %v233_v54 = vadd.f32 %v232_v52, %v213_v51 }
  0xc1   :  { %v253_v56 = vadd.f32 %v252_v53, %v233_v54 }
  0xc3   :  { %v273_v57 = vadd.f32 %v272_v55, %v253_v56 }
  0xc5   :  { %1224 = vmatpush.xpose.msk.msra.mxu1 %vm131_vm0, %v273_v57  ;;  %1248 = vmatpush.xpose.msk.msrb.mxu3 %vm131_vm0, %v273_v57 }
  0xc8   :  { %1225 = vmatmul.msk.f32.vlgmr.msra.gmra.mxu1 %vm131_vm0, %v275_v58  ;;  %1226 = vmatmul.msk.f32.vlgmr.msrb.gmra.mxu3 %vm131_vm0, %v276_v59 }
 0x145   :  { %v303_v61 = vpop.f32.mrf.mxu1 }
 0x146   :  { %v1657_v62 = vmul.f32 0.5, %v303_v61 }
 0x148   :  { %v311_v63 = vand.u32 2147483647, %v1657_v62  ;;  %v314_v0 = vand.u32 2139095040, %v1657_v62 }
 0x14a   :  { %v315_v1 = vshrl.u32 %v314_v0, 23  ;;  %v318_v2 = vand.u32 8388607, %v311_v63 }
 0x14b   :  { %v306_v4 = vpop.f32.mrf.mxu3 }
 0x14c   :  { %v1227_v5 = vadd.s32 4294967169, %v315_v1  ;;  %v319_v6 = vor.u32 8388608, %v318_v2  ;;  %v1663_v7 = vmul.f32 0.5, %v306_v4 }
 0x14e   :  { %v321_v8 = vadd.s32 1, %v1227_v5  ;;  %v465_v9 = vand.u32 2147483647, %v1663_v7  ;;  %v468_v10 = vand.u32 2139095040, %v1663_v7  ;;  %v1667_v11 = vshll.u32 %v319_v6, 8 }
 0x150   :  { %vm322_vm1 = vcmp.gt.s32.totalorder %v321_v8, 0  ;;  %v469_v13 = vshrl.u32 %v468_v10, 23  ;;  %v472_v14 = vand.u32 8388607, %v465_v9  ;;  %v360_v18 = vand.u32 65535, %v1667_v11 }
 0x151   :  { %v323_v12 = vsel %vm322_vm1, %v321_v8, 0  ;;  %v361_v57 = vshrl.u32 %v1667_v11, 16 }
 0x152   :  { %v325_v15 = vand.u32 31, %v323_v12  ;;  %v324_v16 = vshrl.u32 %v323_v12, 5  ;;  %v1230_v19 = vadd.s32 4294967169, %v469_v13  ;;  %v473_v26 = vor.u32 8388608, %v472_v14 }
 0x154   :  { %v326_v17 = vsub.s32 32, %v325_v15  ;;  %v328_v21 = vshll.u32 %v1271_v20, %v325_v15  ;;  %v331_v23 = vshll.u32 %v1272_v22, %v325_v15  ;;  %v334_v25 = vshll.u32 %v1273_v24, %v325_v15 }
 0x155   :  { %v337_v31 = vshll.u32 %v1274_v29, %v325_v15  ;;  %v340_v34 = vshll.u32 %v1275_v32, %v325_v15  ;;  %vm343_vm2 = vcmp.lt.s32.totalorder %v324_v16, 1  ;;  %v475_v40 = vadd.s32 1, %v1230_v19 }
 0x156   :  { %v329_v27 = vshrl.u32 %v1272_v22, %v326_v17  ;;  %v332_v28 = vshrl.u32 %v1273_v24, %v326_v17  ;;  %v335_v30 = vshrl.u32 %v1274_v29, %v326_v17  ;;  %v338_v33 = vshrl.u32 %v1275_v32, %v326_v17 }
 0x157   :  { %v341_v36 = vshrl.u32 %v1276_v35, %v326_v17  ;;  %vm344_vm3 = vcmp.lt.s32.totalorder %v324_v16, 2  ;;  %vm346_vm4 = vcmp.lt.s32.totalorder %v324_v16, 4  ;;  %v327_v45 = vshrl.u32 %v1271_v20, %v326_v17 }
 0x158   :  { %v330_v37 = vor.u32 %v329_v27, %v328_v21  ;;  %v333_v38 = vor.u32 %v332_v28, %v331_v23  ;;  %v336_v39 = vor.u32 %v335_v30, %v334_v25  ;;  %v339_v42 = vor.u32 %v338_v33, %v337_v31 }
 0x159   :  { %v342_v44 = vor.u32 %v341_v36, %v340_v34  ;;  %vm345_vm5 = vcmp.lt.s32.totalorder %v324_v16, 3  ;;  %vm476_vm6 = vcmp.gt.s32.totalorder %v475_v40, 0  ;;  %v1695_v2 = vshll.u32 %v473_v26, 8 }
 0x15a   :  { %v348_v46 = vsel %vm346_vm4, %v336_v39, 2102212464  ;;  %v351_v47 = vsel %vm343_vm2, %v330_v37, %v333_v38  ;;  %v355_v48 = vsel %vm343_vm2, %v333_v38, %v336_v39  ;;  %v352_v49 = vsel %vm346_vm4, %v339_v42, 920167782 }
 0x15b   :  { %v356_v50 = vsel %vm346_vm4, %v342_v44, 1326507024  ;;  %v347_v51 = vsel %vm343_vm2, %v327_v45, %v330_v37  ;;  %v349_v52 = vsel %vm345_vm5, %v333_v38, %v348_v46  ;;  %v353_v53 = vsel %vm345_vm5, %v336_v39, %v352_v49 }
 0x15c   :  { %v357_v54 = vsel %vm345_vm5, %v339_v42, %v356_v50  ;;  %v354_v55 = vsel %vm344_vm3, %v351_v47, %v353_v53  ;;  %v477_v58 = vsel %vm476_vm6, %v475_v40, 0  ;;  %v1693_v60 = vsel %vm344_vm3, %v347_v51, %v349_v52 }
 0x15d   :  { %v358_v56 = vsel %vm344_vm3, %v355_v48, %v357_v54  ;;  %v384_v0 = vand.u32 65535, %v354_v55  ;;  %v385_v1 = vshrl.u32 %v354_v55, 16  ;;  %v1697_v5 = vshrl.u32 %v477_v58, 5 }
 0x15e   :  { %v362_v59 = vand.u32 65535, %v358_v56  ;;  %v363_v61 = vshrl.u32 %v358_v56, 16  ;;  %v479_v41 = vand.u32 31, %v477_v58 }
 0x15f   :  { %v387_v10 = vmul.u32 %v385_v1, %v360_v18  ;;  %v388_v12 = vmul.u32 %v384_v0, %v361_v57  ;;  %v386_v15 = vmul.u32 %v384_v0, %v360_v18  ;;  %v389_v17 = vmul.u32 %v385_v1, %v361_v57 }
 0x160   :  { %v365_v3 = vmul.u32 %v363_v61, %v360_v18  ;;  %v366_v4 = vmul.u32 %v362_v59, %v361_v57  ;;  %v364_v6 = vmul.u32 %v362_v59, %v360_v18  ;;  %v367_v8 = vmul.u32 %v363_v61, %v361_v57 }
 0x161   :  { %v390_v16 = vshll.u32 %v387_v10, 16  ;;  %v391_v23 = vshrl.u32 %v387_v10, 16  ;;  %v392_v26 = vshll.u32 %v388_v12, 16  ;;  %v1699_v27 = vsub.s32 32, %v479_v41 }
 0x162   :  { %v368_v13 = vshll.u32 %v365_v3, 16  ;;  %v369_v14 = vshrl.u32 %v365_v3, 16  ;;  %v370_v19 = vshll.u32 %v366_v4, 16  ;;  %v371_v21 = vshrl.u32 %v366_v4, 16 }
 0x163   :  { %v393_v30 = vshrl.u32 %v388_v12, 16  ;;  %vm394_vm8 = vc.u32 %v386_v15, %v390_v16  ;;  %v396_v31 = vadd.s32 %v390_v16, %v386_v15  ;;  %v482_v18 = vshll.u32 %v1271_v20, %v479_v41 }
 0x164   :  { %vm372_vm7 = vc.u32 %v364_v6, %v368_v13  ;;  %v374_v25 = vadd.s32 %v368_v13, %v364_v6  ;;  %v395_v34 = vsel %vm394_vm8, 1, %v1267_v43  ;;  %v485_v38 = vshll.u32 %v1272_v22, %v479_v41 }
 0x165   :  { %v373_v28 = vsel %vm372_vm7, 1, %v1267_v43  ;;  %v397_v37 = vadd.s32 %v395_v34, %v389_v17  ;;  %vm398_vm10 = vc.u32 %v396_v31, %v392_v26  ;;  %v483_v42 = vshrl.u32 %v1272_v22, %v1699_v27 }
 0x166   :  { %v375_v33 = vadd.s32 %v373_v28, %v367_v8  ;;  %vm376_vm9 = vc.u32 %v374_v25, %v370_v19  ;;  %v399_v40 = vsel %vm398_vm10, 1, %v1267_v43  ;;  %v486_v44 = vshrl.u32 %v1273_v24, %v1699_v27 }
 0x167   :  { %v377_v36 = vsel %vm376_vm9, 1, %v1267_v43  ;;  %v401_v45 = vadd.s32 %v399_v40, %v397_v37  ;;  %v488_v46 = vshll.u32 %v1273_v24, %v479_v41  ;;  %v489_v47 = vshrl.u32 %v1274_v29, %v1699_v27 }
 0x168   :  { %v379_v39 = vadd.s32 %v377_v36, %v375_v33  ;;  %v491_v48 = vshll.u32 %v1274_v29, %v479_v41  ;;  %v1715_v50 = vor.u32 %v483_v42, %v482_v18  ;;  %v1717_v51 = vor.u32 %v486_v44, %v485_v38 }
 0x169   :  { %v492_v52 = vshrl.u32 %v1275_v32, %v1699_v27  ;;  %v402_v22 = vadd.s32 %v401_v45, %v391_v23  ;;  %v490_v53 = vor.u32 %v489_v47, %v488_v46  ;;  %v494_v54 = vshll.u32 %v1275_v32, %v479_v41 }
 0x16a   :  { %v380_v49 = vadd.s32 %v379_v39, %v369_v14  ;;  %v495_v24 = vshrl.u32 %v1276_v35, %v1699_v27  ;;  %v1726_v56 = vadd.s32 %v396_v31, %v392_v26  ;;  %vm497_vm11 = vcmp.lt.s32.totalorder %v1697_v5, 1 }
 0x16b   :  { %v493_v29 = vor.u32 %v492_v52, %v491_v48  ;;  %v403_v57 = vadd.s32 %v402_v22, %v393_v30  ;;  %vm500_vm12 = vcmp.lt.s32.totalorder %v1697_v5, 4  ;;  %v505_v59 = vsel %vm497_vm11, %v1715_v50, %v1717_v51 }
 0x16c   :  { %v1724_v55 = vadd.s32 %v380_v49, %v371_v21  ;;  %v496_v58 = vor.u32 %v495_v24, %v494_v54  ;;  %vm499_vm14 = vcmp.lt.s32.totalorder %v1697_v5, 3  ;;  %vm498_vm15 = vcmp.lt.s32.totalorder %v1697_v5, 2 }
 0x16d   :  { %v506_v32 = vsel %vm500_vm12, %v493_v29, 920167782  ;;  %v407_v35 = vadd.s32 1, %v403_v57  ;;  %v509_v0 = vsel %vm497_vm11, %v1717_v51, %v490_v53  ;;  %v404_v1 = vmul.u32 %v1667_v11, %v1693_v60 }
 0x16e   :  { %vm406_vm13 = vc.u32 %v1724_v55, %v1726_v56  ;;  %v507_v61 = vsel %vm499_vm14, %v490_v53, %v506_v32  ;;  %v510_v4 = vsel %vm500_vm12, %v496_v58, 1326507024  ;;  %v514_v41 = vand.u32 65535, %v1695_v2 }
 0x16f   :  { %v508_v3 = vsel %vm498_vm15, %v505_v59, %v507_v61  ;;  %v408_v6 = vsel %vm406_vm13, %v407_v35, %v403_v57  ;;  %v511_v8 = vsel %vm499_vm14, %v493_v29, %v510_v4  ;;  %v515_v11 = vshrl.u32 %v1695_v2, 16 }
 0x170   :  { %v538_v10 = vand.u32 65535, %v508_v3  ;;  %v539_v12 = vshrl.u32 %v508_v3, 16  ;;  %v409_v13 = vadd.s32 %v408_v6, %v404_v1  ;;  %v512_v14 = vsel %vm498_vm15, %v509_v0, %v511_v8 }
 0x171   :  { %v516_v60 = vand.u32 65535, %v512_v14  ;;  %v517_v15 = vshrl.u32 %v512_v14, 16  ;;  %v502_v48 = vsel %vm500_vm12, %v490_v53, 2102212464  ;;  %v481_v54 = vshrl.u32 %v1271_v20, %v1699_v27 }
 0x172   :  { %v541_v17 = vmul.u32 %v539_v12, %v514_v41  ;;  %v410_v19 = vadd.s32 536870912, %v409_v13  ;;  %v542_v21 = vmul.u32 %v538_v10, %v515_v11  ;;  %v540_v26 = vmul.u32 %v538_v10, %v514_v41 }
 0x173   :  { %v519_v16 = vmul.u32 %v517_v15, %v514_v41  ;;  %v520_v23 = vmul.u32 %v516_v60, %v515_v11  ;;  %v518_v30 = vmul.u32 %v516_v60, %v514_v41  ;;  %v521_v31 = vmul.u32 %v517_v15, %v515_v11 }
 0x174   :  { %v1757_v25 = vshrl.u32 %v410_v19, 30  ;;  %v544_v28 = vshll.u32 %v541_v17, 16  ;;  %v543_v34 = vmul.u32 %v539_v12, %v515_v11  ;;  %v546_v37 = vshll.u32 %v542_v21, 16 }
 0x175   :  { %v522_v33 = vshll.u32 %v519_v16, 16  ;;  %v524_v36 = vshll.u32 %v520_v23, 16  ;;  %v501_v58 = vsel %vm497_vm11, %v481_v54, %v1715_v50  ;;  %v503_v59 = vsel %vm499_vm14, %v1717_v51, %v502_v48 }
 0x176   :  { %v412_v18 = vshll.u32 %v1757_v25, 30  ;;  %vm548_vm1 = vc.u32 %v540_v26, %v544_v28  ;;  %v550_v40 = vadd.s32 %v544_v28, %v540_v26  ;;  %v523_v53 = vshrl.u32 %v519_v16, 16 }
 0x177   :  { %vm526_vm2 = vc.u32 %v518_v30, %v522_v33  ;;  %v528_v38 = vadd.s32 %v522_v33, %v518_v30  ;;  %v549_v39 = vsel %vm548_vm1, 1, %v1267_v43  ;;  %v545_v32 = vshrl.u32 %v541_v17, 16 }
 0x178   :  { %v413_v42 = vsub.s32 %v409_v13, %v412_v18  ;;  %v527_v44 = vsel %vm526_vm2, 1, %v1267_v43  ;;  %v551_v46 = vadd.s32 %v549_v39, %v543_v34  ;;  %vm552_vm4 = vc.u32 %v550_v40, %v546_v37 }
 0x179   :  { %v529_v45 = vadd.s32 %v527_v44, %v521_v31  ;;  %vm530_vm3 = vc.u32 %v528_v38, %v524_v36  ;;  %v553_v52 = vsel %vm552_vm4, 1, %v1267_v43  ;;  %v525_v61 = vshrl.u32 %v520_v23, 16 }
 0x17a   :  { %vm414_vm5 = vcmp.lt.s32.totalorder %v413_v42, 0  ;;  %v415_v47 = vsub.s32 0, %v413_v42  ;;  %v531_v49 = vsel %vm530_vm3, 1, %v1267_v43  ;;  %v555_v57 = vadd.s32 %v553_v52, %v551_v46 }
 0x17b   :  { %v533_v29 = vadd.s32 %v531_v49, %v529_v45  ;;  %v547_v0 = vshrl.u32 %v542_v21, 16  ;;  %v504_v20 = vsel %vm498_vm15, %v501_v58, %v503_v59  ;;  %v554_v4 = vadd.s32 %v550_v40, %v546_v37 }
 0x17c   :  { %v416_v22 = vsel %vm414_vm5, %v415_v47, %v413_v42  ;;  %v556_v1 = vadd.s32 %v555_v57, %v545_v32  ;;  %v405_v50 = vadd.s32 %v1726_v56, %v1724_v55  ;;  %v558_v14 = vmul.u32 %v1695_v2, %v504_v20 }
 0x17d   :  { %v417_v24 = vclz %v416_v22  ;;  %v534_v43 = vadd.s32 %v533_v29, %v523_v53  ;;  %vm313_vm8 = vcmp.lt.s32.totalorder %v1657_v62, 0  ;;  %vm1785_vm9 = vcmp.le.f32.partialorder %v311_v63, 0.7853982 }
 0x17e   :  { %v557_v41 = vadd.s32 %v556_v1, %v547_v0  ;;  %vm467_vm12 = vcmp.lt.s32.totalorder %v1663_v7, 0  ;;  %vm1803_vm13 = vcmp.le.f32.partialorder %v465_v9, 0.7853982  ;;  %vm454_vm3 = vweird.f32 %v1657_v62 }
 0x17f   :  { %v1228_v35 = vadd.s32 4294967294, %v417_v24  ;;  %v535_v3 = vadd.s32 %v534_v43, %v525_v61 }
 0x180   :  { %v561_v8 = vadd.s32 1, %v557_v41 }
 0x181   :  { %vm1229_vm6 = vcmp.lt.s32.totalorder %v1228_v35, 0  ;;  %vm560_vm7 = vc.u32 %v535_v3, %v554_v4  ;;  %v559_v47 = vadd.s32 %v554_v4, %v535_v3 }
 0x182   :  { %v420_v27 = vsel %vm1229_vm6, 0, %v1228_v35  ;;  %v562_v11 = vsel %vm560_vm7, %v561_v8, %v557_v41  ;;  %vm608_vm6 = vweird.f32 %v1663_v7 }
 0x183   :  { %v421_v6 = vsub.s32 32, %v420_v27  ;;  %v425_v51 = vsub.s32 4294967266, %v420_v27  ;;  %v422_v10 = vshll.u32 %v413_v42, %v420_v27  ;;  %v563_v15 = vadd.s32 %v562_v11, %v558_v14 }
 0x184   :  { %v435_v42 = vsub.s32 4, %v1757_v25 }
 0x185   :  { %v423_v12 = vshrl.u32 %v405_v50, %v421_v6  ;;  %v426_v13 = vadd.s32 127, %v425_v51  ;;  %v564_v19 = vadd.s32 536870912, %v563_v15  ;;  %v982_v6 = vpop.permute.xlu1 %981 }
 0x186   :  { %v436_v22 = vsel %vm313_vm8, %v435_v42, %v1757_v25 }
 0x187   :  { %v424_v60 = vor.u32 %v423_v12, %v422_v10  ;;  %v427_v5 = vshll.u32 %v426_v13, 23  ;;  %v1779_v23 = vshrl.u32 %v564_v19, 30  ;;  %v438_v32 = vsel %vm1785_vm9, 0, %v436_v22 }
 0x188   :  { %v763_v0 = vadd.s32 3, %v438_v32  ;;  %v455_v13 = vand.u32 3, %v438_v32  ;;  %v1040_v32 = vpop.permute.xlu2 %1039 }
 0x189   :  { %v428_v17 = vor.u32 4788187, %v427_v5  ;;  %v431_v16 = vcvt.s32.f32 %v424_v60  ;;  %v566_v56 = vshll.u32 %v1779_v23, 30  ;;  %v589_v10 = vsub.s32 4, %v1779_v23 }
 0x18a   :  { %v764_v25 = vand.u32 3, %v763_v0  ;;  %vm457_vm2 = vcmp.eq.s32.totalorder %v455_v13, 0  ;;  %vm456_vm4 = vcmp.lt.s32.totalorder %v455_v13, 2  ;;  %vm460_vm5 = vcmp.eq.s32.totalorder %v455_v13, 2 }
 0x18b   :  { %v429_v21 = vand.u32 2147483647, %v428_v17  ;;  %v567_v28 = vsub.s32 %v563_v15, %v566_v56  ;;  %v590_v9 = vsel %vm467_vm12, %v589_v10, %v1779_v23 }
 0x18c   :  { %vm766_vm14 = vcmp.eq.s32.totalorder %v764_v25, 0  ;;  %vm765_vm15 = vcmp.lt.s32.totalorder %v764_v25, 2  ;;  %vm769_vm1 = vcmp.eq.s32.totalorder %v764_v25, 2 }
 0x18d   :  { %v432_v55 = vmul.f32 %v431_v16, %v429_v21  ;;  %vm568_vm10 = vcmp.lt.s32.totalorder %v567_v28, 0  ;;  %v569_v31 = vsub.s32 0, %v567_v28 }
 0x18f   :  { %v433_v26 = vxor.u32 2147483648, %v432_v55  ;;  %v570_v18 = vsel %vm568_vm10, %v569_v31, %v567_v28 }
 0x190   :  { %v571_v36 = vclz %v570_v18 }
 0x191   :  { %v434_v30 = vsel %vm313_vm8, %v433_v26, %v432_v55  ;;  %v592_v55 = vsel %vm1803_vm13, 0, %v590_v9 }
 0x192   :  { %v437_v33 = vsel %vm1785_vm9, %v1657_v62, %v434_v30  ;;  %v1231_v39 = vadd.s32 4294967294, %v571_v36 }
 0x193   :  { %v439_v34 = vmul.f32 %v437_v33, %v437_v33 }
 0x194   :  { %vm1232_vm11 = vcmp.lt.s32.totalorder %v1231_v39, 0 }
 0x195   :  { %v440_v37 = vmul.f32 -0.001358992, %v439_v34  ;;  %v447_v38 = vmul.f32 -0.00019511016, %v439_v34  ;;  %v574_v46 = vsel %vm1232_vm11, 0, %v1231_v39 }
 0x196   :  { %v575_v48 = vsub.s32 32, %v574_v46  ;;  %v579_v49 = vsub.s32 4294967266, %v574_v46  ;;  %v576_v54 = vshll.u32 %v567_v28, %v574_v46 }
 0x197   :  { %v441_v40 = vadd.f32 0.041655596, %v440_v37  ;;  %v448_v63 = vadd.f32 0.008332121, %v447_v38  ;;  %v609_v38 = vand.u32 3, %v592_v55 }
 0x198   :  { %v577_v24 = vshrl.u32 %v559_v47, %v575_v48  ;;  %v580_v29 = vadd.s32 127, %v579_v49 }
 0x199   :  { %v442_v44 = vmul.f32 %v441_v40, %v439_v34  ;;  %v449_v45 = vmul.f32 %v448_v63, %v439_v34  ;;  %vm610_vm7 = vcmp.lt.s32.totalorder %v609_v38, 2  ;;  %vm611_vm8 = vcmp.eq.s32.totalorder %v609_v38, 0 }
 0x19a   :  { %v578_v59 = vor.u32 %v577_v24, %v576_v54  ;;  %v581_v53 = vshll.u32 %v580_v29, 23  ;;  %vm614_vm9 = vcmp.eq.s32.totalorder %v609_v38, 2 }
 0x19b   :  { %v450_v52 = vadd.f32 -0.16666654, %v449_v45  ;;  %v443_v57 = vadd.f32 -0.4999988, %v442_v44 }
 0x19c   :  { %v582_v61 = vor.u32 4788187, %v581_v53  ;;  %v585_v20 = vcvt.s32.f32 %v578_v59 }
 0x19d   :  { %v451_v58 = vmul.f32 %v450_v52, %v439_v34  ;;  %v444_v43 = vmul.f32 %v443_v57, %v439_v34 }
 0x19e   :  { %v583_v1 = vand.u32 2147483647, %v582_v61 }
 0x19f   :  { %v452_v35 = vadd.f32 1.0, %v451_v58  ;;  %v445_v4 = vadd.f32 1.0, %v444_v43 }
 0x1a0   :  { %v586_v3 = vmul.f32 %v585_v20, %v583_v1 }
 0x1a1   :  { %v453_v27 = vmul.f32 %v452_v35, %v437_v33  ;;  %v461_v8 = vxor.u32 2147483648, %v445_v4  ;;  %v918_v33 = vadd.s32 3, %v592_v55 }
 0x1a2   :  { %v587_v41 = vxor.u32 2147483648, %v586_v3 }
 0x1a3   :  { %v458_v50 = vxor.u32 2147483648, %v453_v27  ;;  %v771_v60 = vsel %vm769_vm1, %v461_v8, %v453_v27  ;;  %v462_v56 = vsel %vm460_vm5, %v461_v8, %v453_v27  ;;  %v919_v40 = vand.u32 3, %v918_v33  ;;  %v1004_v33 = vpop.permute.xlu1 %1003 }
 0x1a4   :  { %v588_v51 = vsel %vm467_vm12, %v587_v41, %v586_v3 }
 0x1a5   :  { %v591_v12 = vsel %vm1803_vm13, %v1663_v7, %v588_v51  ;;  %v768_v14 = vsel %vm766_vm14, %v445_v4, %v458_v50  ;;  %v459_v19 = vsel %vm457_vm2, %v445_v4, %v458_v50  ;;  %vm920_vm10 = vcmp.lt.s32.totalorder %v919_v40, 2 }
 0x1a6   :  { %v593_v11 = vmul.f32 %v591_v12, %v591_v12  ;;  %v772_v17 = vsel %vm765_vm15, %v768_v14, %v771_v60  ;;  %v463_v30 = vsel %vm456_vm4, %v459_v19, %v462_v56  ;;  %vm921_vm11 = vcmp.eq.s32.totalorder %v919_v40, 0  ;;  %v987_v60 = vpop.permute.xlu0 %986  ;;  %v1036_v56 = vpop.permute.xlu2 %1035 }
 0x1a7   :  { %v773_v26 = vsel %vm454_vm3, nan, %v772_v17  ;;  %v464_v18 = vsel %vm454_vm3, nan, %v463_v30  ;;  %vm924_vm12 = vcmp.eq.s32.totalorder %v919_v40, 2  ;;  %vm1217_vm13 = vcmask 60416  }
 0x1a8   :  { %v594_v5 = vmul.f32 -0.001358992, %v593_v11  ;;  %v601_v15 = vmul.f32 -0.00019511016, %v593_v11  ;;  %v934_v34 = vrot.slane %v773_v26, 4  ;;  %v930_v63 = vrot.slane %v464_v18, 4 }
 0x1aa   :  { %v595_v21 = vadd.f32 0.041655596, %v594_v5  ;;  %v602_v16 = vadd.f32 0.008332121, %v601_v15  ;;  %v936_v42 = vmul.f32 %v934_v34, %v464_v18  ;;  %v932_v47 = vmul.f32 %v930_v63, %v464_v18 }
 0x1ab   :  { %v938_v24 = vmul.f32 %v930_v63, %v773_v26  ;;  %v939_v29 = vmul.f32 %v934_v34, %v773_v26 }
 0x1ac   :  { %v596_v28 = vmul.f32 %v595_v21, %v593_v11  ;;  %v603_v2 = vmul.f32 %v602_v16, %v593_v11  ;;  %v937_v48 = vsub.f32 0.0, %v936_v42 }
 0x1ae   :  { %v597_v23 = vadd.f32 -0.4999988, %v596_v28  ;;  %v604_v31 = vadd.f32 -0.16666654, %v603_v2 }
 0x1b0   :  { %v598_v36 = vmul.f32 %v597_v23, %v593_v11  ;;  %v605_v37 = vmul.f32 %v604_v31, %v593_v11 }
 0x1b2   :  { %v599_v39 = vadd.f32 1.0, %v598_v36  ;;  %v606_v62 = vadd.f32 1.0, %v605_v37 }
 0x1b4   :  { %v607_v44 = vmul.f32 %v606_v62, %v591_v12  ;;  %v615_v45 = vxor.u32 2147483648, %v599_v39 }
 0x1b6   :  { %v612_v46 = vxor.u32 2147483648, %v607_v44  ;;  %v616_v52 = vsel %vm614_vm9, %v615_v45, %v607_v44  ;;  %v926_v54 = vsel %vm924_vm12, %v615_v45, %v607_v44 }
 0x1b8   :  { %v613_v49 = vsel %vm611_vm8, %v599_v39, %v612_v46  ;;  %v923_v22 = vsel %vm921_vm11, %v599_v39, %v612_v46  ;;  %v1008_v46 = vpop.permute.xlu0 %1007 }
 0x1b9   :  { %v617_v57 = vsel %vm610_vm7, %v613_v49, %v616_v52  ;;  %v927_v58 = vsel %vm920_vm10, %v923_v22, %v926_v54 }
 0x1ba   :  { %v618_v59 = vsel %vm608_vm6, nan, %v617_v57  ;;  %v928_v53 = vsel %vm608_vm6, nan, %v927_v58 }
 0x1bb   :  { %v940_v35 = vmul.f32 %v932_v47, %v618_v59  ;;  %v941_v61 = vmul.f32 %v939_v29, %v928_v53  ;;  %v943_v43 = vmul.f32 %v937_v48, %v618_v59  ;;  %v944_v0 = vmul.f32 %v938_v24, %v928_v53 }
 0x1bc   :  { %v946_v1 = vmul.f32 %v937_v48, %v928_v53  ;;  %v947_v20 = vmul.f32 %v938_v24, %v618_v59  ;;  %v949_v27 = vmul.f32 %v939_v29, %v618_v59  ;;  %v950_v3 = vmul.f32 %v932_v47, %v928_v53 }
 0x1bd   :  { %v942_v4 = vadd.f32 %v941_v61, %v940_v35  ;;  %v945_v25 = vsub.f32 %v943_v43, %v944_v0  ;;  %v1068_v35 = vpop.permute.xlu2 %1067 }
 0x1be   :  { %v948_v41 = vadd.f32 %v947_v20, %v946_v1  ;;  %v951_v50 = vsub.f32 %v949_v27, %v950_v3 }
 0x1bf   :  { %v953_v51 = vrot.slane %v942_v4, 4  ;;  %v962_v8 = vrot.slane %v945_v25, 4 }
 0x1c0   :  { %v957_v10 = vrot.slane %v948_v41, 4  ;;  %v966_v12 = vrot.slane %v951_v50, 4 }
 0x1c1   :  { %v955_v7 = vmul.f32 %v953_v51, %v618_v59  ;;  %v964_v13 = vmul.f32 %v962_v8, %v618_v59  ;;  %v970_v14 = vmul.f32 %v953_v51, %v928_v53  ;;  %v973_v11 = vmul.f32 %v962_v8, %v928_v53 }
 0x1c2   :  { %v959_v9 = vmul.f32 %v957_v10, %v928_v53  ;;  %v968_v5 = vmul.f32 %v966_v12, %v928_v53  ;;  %v971_v15 = vmul.f32 %v957_v10, %v618_v59  ;;  %v974_v17 = vmul.f32 %v966_v12, %v618_v59  ;;  %v1072_v12 = vpop.permute.xlu1 %1071 }
 0x1c4   :  { %v1820_v19 = vsub.f32 %v955_v7, %v959_v9  ;;  %v1822_v21 = vsub.f32 %v964_v13, %v968_v5  ;;  %v972_v16 = vadd.f32 %v971_v15, %v970_v14  ;;  %v975_v55 = vadd.f32 %v974_v17, %v973_v11 }
 0x1c6   :  { %v978_v26 = vsub.f32 %v972_v16, %v1820_v19  ;;  %v995_v28 = vsub.f32 %v975_v55, %v1822_v21  ;;  %v1045_v34 = vperm.slane %v1820_v19, 6  ;;  %v1051_v18 = vperm.slane %v1822_v21, 6 }
 0x1c7   :  { %v992_v36 = vperm.slane %v1820_v19, 4  ;;  %v999_v37 = vperm.slane %v1822_v21, 4  ;;  %v1013_v45 = vperm.slane %v1820_v19, 5  ;;  %v1019_v48 = vperm.slane %v1822_v21, 5 }
 0x1c8   :  { %v1042_v2 = vperm.slane %v978_v26, 6  ;;  %v1048_v30 = vperm.slane %v995_v28, 6  ;;  %v989_v23 = vperm.slane %v978_v26, 4  ;;  %v996_v31 = vperm.slane %v995_v28, 4 }
 0x1c9   :  { %v1010_v62 = vperm.slane %v978_v26, 5  ;;  %v1016_v40 = vperm.slane %v995_v28, 5  ;;  %v1074_v49 = vperm.slane %v978_v26, 7  ;;  %v1077_v52 = vperm.slane %v1820_v19, 7 }
 0x1ca   :  { %v990_v38 = vmul.f32 %v989_v23, %v982_v6  ;;  %v997_v39 = vmul.f32 %v996_v31, %v982_v6  ;;  %v1044_v63 = vmul.f32 %v1042_v2, %v1040_v32  ;;  %v991_v42 = vmul.f32 %v989_v23, %v987_v60 }
 0x1cb   :  { %v998_v44 = vmul.f32 %v996_v31, %v987_v60  ;;  %v1050_v47 = vmul.f32 %v1048_v30, %v1040_v32  ;;  %v1043_v24 = vmul.f32 %v1042_v2, %v1036_v56  ;;  %v1049_v29 = vmul.f32 %v1048_v30, %v1036_v56 }
 0x1cc   :  { %v993_v22 = vadd.f32 %v992_v36, %v990_v38  ;;  %v1000_v54 = vadd.f32 %v999_v37, %v997_v39  ;;  %v1011_v57 = vmul.f32 %v1010_v62, %v1004_v33  ;;  %v1017_v58 = vmul.f32 %v1016_v40, %v1004_v33 }
 0x1cd   :  { %v1012_v59 = vmul.f32 %v1010_v62, %v1008_v46  ;;  %v1018_v53 = vmul.f32 %v1016_v40, %v1008_v46  ;;  %v1047_v61 = vadd.f32 %v1045_v34, %v1044_v63  ;;  %v994_v43 = vadd.f32 %v992_v36, %v991_v42 }
 0x1ce   :  { %v1001_v0 = vadd.f32 %v999_v37, %v998_v44  ;;  %v1080_v1 = vperm.slane %v995_v28, 7  ;;  %v1014_v20 = vadd.f32 %v1013_v45, %v1011_v57  ;;  %v1020_v32 = vadd.f32 %v1019_v48, %v1017_v58  ;;  %v1103_v57 = vld [vmem:[%s1876_s4 + $0x8] sm:$0xff] }
 0x1cf   :  { %v1015_v27 = vadd.f32 %v1013_v45, %v1012_v59  ;;  %v1021_v3 = vadd.f32 %v1019_v48, %v1018_v53  ;;  %v1053_v4 = vadd.f32 %v1051_v18, %v1050_v47  ;;  %v1046_v25 = vadd.f32 %v1045_v34, %v1043_v24  ;;  %v1099_v58 = vld [vmem:[%s1877_s3 + $0x8] sm:$0xff]  ;;  %v1104_v59 = vld [vmem:[%s1876_s4 + $0x10] sm:$0xff] }
 0x1d0   :  { %v1052_v41 = vadd.f32 %v1051_v18, %v1049_v29  ;;  %v1075_v50 = vmul.f32 %v1074_v49, %v1068_v35  ;;  %v1022_v6 = vmul.f32 %v1014_v20, %v993_v22  ;;  %v1024_v51 = vmul.f32 %v1020_v32, %v1000_v54  ;;  %v1102_v29 = vld [vmem:[%s1876_s4] sm:$0xff]  ;;  %v1100_v53 = vld [vmem:[%s1877_s3 + $0x10] sm:$0xff] }
 0x1d1   :  { %v1028_v8 = vmul.f32 %v1020_v32, %v993_v22  ;;  %v1030_v10 = vmul.f32 %v1014_v20, %v1000_v54  ;;  %v1023_v7 = vmul.f32 %v1015_v27, %v994_v43  ;;  %v1025_v13 = vmul.f32 %v1021_v3, %v1001_v0 }
 0x1d2   :  { %v1029_v14 = vmul.f32 %v1021_v3, %v994_v43  ;;  %v1031_v11 = vmul.f32 %v1015_v27, %v1001_v0  ;;  %v1026_v60 = vsub.f32 %v1022_v6, %v1024_v51  ;;  %v1081_v5 = vmul.f32 %v1080_v1, %v1068_v35  ;;  %v1105_v35 = vld [vmem:[%s1876_s4 + $0x18] sm:$0xff] }
 0x1d3   :  { %v1032_v9 = vadd.f32 %v1030_v10, %v1028_v8  ;;  %v1083_v15 = vperm.slane %v1822_v21, 7  ;;  %v1027_v17 = vsub.f32 %v1023_v7, %v1025_v13  ;;  %v1076_v16 = vmul.f32 %v1074_v49, %v1072_v12  ;;  %v1188_v7 = vld [vmem:[%s1878_s5] sm:$0xf] }
 0x1d4   :  { %v1033_v19 = vadd.f32 %v1031_v11, %v1029_v14  ;;  %v1082_v55 = vmul.f32 %v1080_v1, %v1072_v12  ;;  %v1054_v56 = vmul.f32 %v1046_v25, %v1026_v60  ;;  %v1060_v28 = vmul.f32 %v1052_v41, %v1026_v60 }
 0x1d5   :  { %v1056_v26 = vmul.f32 %v1052_v41, %v1032_v9  ;;  %v1062_v2 = vmul.f32 %v1046_v25, %v1032_v9  ;;  %v1055_v30 = vmul.f32 %v1047_v61, %v1027_v17  ;;  %v1061_v31 = vmul.f32 %v1053_v4, %v1027_v17 }
 0x1d6   :  { %v1057_v23 = vmul.f32 %v1053_v4, %v1033_v19  ;;  %v1063_v33 = vmul.f32 %v1047_v61, %v1033_v19  ;;  %v1078_v36 = vadd.f32 %v1077_v52, %v1075_v50  ;;  %v1084_v37 = vadd.f32 %v1083_v15, %v1081_v5  ;;  %v1101_v61 = vld [vmem:[%s1877_s3 + $0x18] sm:$0xff] }
 0x1d7   :  { %v1058_v34 = vsub.f32 %v1054_v56, %v1056_v26  ;;  %v1064_v18 = vadd.f32 %v1062_v2, %v1060_v28  ;;  %v1079_v62 = vadd.f32 %v1077_v52, %v1076_v16  ;;  %v1085_v21 = vadd.f32 %v1083_v15, %v1082_v55  ;;  %v1098_v52 = vld [vmem:[%s1877_s3] sm:$0xff] }
 0x1d8   :  { %v1059_v38 = vsub.f32 %v1055_v30, %v1057_v23  ;;  %v1065_v39 = vadd.f32 %v1063_v33, %v1061_v31 }
 0x1d9   :  { %v1086_v40 = vmul.f32 %v1078_v36, %v1058_v34  ;;  %v1088_v63 = vmul.f32 %v1084_v37, %v1064_v18  ;;  %v1092_v42 = vmul.f32 %v1084_v37, %v1058_v34  ;;  %v1094_v44 = vmul.f32 %v1078_v36, %v1064_v18 }
 0x1da   :  { %v1087_v45 = vmul.f32 %v1079_v62, %v1059_v38  ;;  %v1089_v46 = vmul.f32 %v1085_v21, %v1065_v39  ;;  %v1093_v47 = vmul.f32 %v1085_v21, %v1059_v38  ;;  %v1095_v48 = vmul.f32 %v1079_v62, %v1065_v39 }
 0x1db   :  { %v1096_v54 = vadd.f32 %v1094_v44, %v1092_v42  ;;  %v1090_v24 = vsub.f32 %v1086_v40, %v1088_v63 }
 0x1dc   :  { %v1091_v49 = vsub.f32 %v1087_v45, %v1089_v46  ;;  %v1097_v22 = vadd.f32 %v1095_v48, %v1093_v47 }
 0x1de   :  { %1132 = vmatpush.msra.mxu2 %v1097_v22  ;;  %1173 = vmatpush.msra.mxu3 %v1091_v49 }
 0x1e0   :  { %1133 = vmatpush.msra.mxu2 %v1096_v54  ;;  %1174 = vmatpush.msra.mxu3 %v1090_v24 }
 0x1e1   :  { %1239 = vmatmul.msk.f32.vlgmr.msra.gmra.mxu2 %vm131_vm0, %v1102_v29  ;;  %1243 = vmatmul.msk.f32.vlgmr.msra.gmra.mxu3 %vm131_vm0, %v1098_v52 }
 0x1e9   :  { %1240 = vmatmul.msk.f32.gmra.mxu2 %vm131_vm0, %v1103_v57  ;;  %1244 = vmatmul.msk.f32.gmra.mxu3 %vm131_vm0, %v1099_v58 }
 0x1f1   :  { %1241 = vmatmul.msk.f32.gmra.mxu2 %vm131_vm0, %v1104_v59  ;;  %1245 = vmatmul.msk.f32.gmra.mxu3 %vm131_vm0, %v1100_v53 }
 0x1f9   :  { %1242 = vmatmul.msk.f32.gmra.mxu2 %vm131_vm0, %v1105_v35  ;;  %1246 = vmatmul.msk.f32.gmra.mxu3 %vm131_vm0, %v1101_v61  ;;  %vm1193_vm0 = vcmask 261120  }
 0x264   :  { %v1135_v43 = vpop.f32.mrf.mxu2  ;;  %v1176_v0 = vpop.f32.mrf.mxu3 }
 0x265   :  { %v1177_v51 = vadd.f32 %v1176_v0, %v1135_v43 }
 0x267   :  { %v1189_v12 = vmul.f32 %v1177_v51, %v1177_v51 }
 0x26c   :  { %v1138_v1 = vpop.f32.mrf.mxu2  ;;  %v1179_v20 = vpop.f32.mrf.mxu3 }
 0x26d   :  { %v1180_v50 = vadd.f32 %v1179_v20, %v1138_v1 }
 0x26f   :  { %v1190_v10 = vmul.f32 %v1180_v50, %v1180_v50 }
 0x274   :  { %v1141_v32 = vpop.f32.mrf.mxu2  ;;  %v1182_v27 = vpop.f32.mrf.mxu3 }
 0x275   :  { %v1183_v25 = vadd.f32 %v1182_v27, %v1141_v32 }
 0x277   :  { %v1191_v8 = vmul.f32 %v1183_v25, %v1183_v25 }
 0x27c   :  { %v1144_v3 = vpop.f32.mrf.mxu2  ;;  %v1185_v4 = vpop.f32.mrf.mxu3 }
 0x27d   :  { %v1186_v41 = vadd.f32 %v1185_v4, %v1144_v3 }
 0x27f   :  { %v1192_v6 = vmul.f32 %v1186_v41, %v1186_v41 }
 0x281   :  { %1209 = vmatpush.msra.mxu0 %v1192_v6 }
 0x283   :  { %1210 = vmatpush.msra.mxu0 %v1191_v8 }
 0x285   :  { %1211 = vmatpush.msra.mxu0 %v1190_v10 }
 0x287   :  { %1212 = vmatpush.msra.mxu0 %v1189_v12 }
 0x288   :  { %1247 = vmatmul.msk.f32.vlgmr.msra.gmra.mxu0 %vm1193_vm0, %v1188_v7 }
 0x305   :  { %v1214_v13 = vpop.f32.mrf.mxu0 }
 0x306   :  { %1218 = vst.msk [vmem:[%s1879_s7] sm:$0xf] %vm1217_vm13, %v1214_v13 }

</bundles_post_ra>
